<compile_context>
chip_gen: v6e
topology: v6e:2x2x1
jax: 0.10.0
libtpu: 0.0.40
codegen_flags: <defaults>
</compile_context>

<pallas_src>
import jax
import jax.numpy as jnp
from jax import lax
from jax.experimental import pallas as pl
from jax.experimental.pallas import tpu as pltpu


# ----------------------------- Pallas kernel -------------------------------

def fused_lstm_embedder_kernel(*refs):
    # refs layout:
    #   refs[0]                      : x2d      (T*Bp, F)   bf16
    #   refs[1 + 3l : 4 + 3l]        : (wih_t (Fin,4H) bf16, whh_t (H,4H) bf16,
    #                                   b (1,4H) f32)        for layer l
    #   refs[-4], refs[-3]           : wproj_t (H, O) bf16, bproj (1, O) f32
    #   refs[-2]                     : out_ref  (Bp, O) f32
    #   refs[-1]                     : seq_ref  (T*Bp, H) f32 VMEM scratch
    n_layers = (len(refs) - 5) // 3
    x_ref = refs[0]
    layer_refs = [refs[1 + 3 * l: 4 + 3 * l] for l in range(n_layers)]
    wproj_ref = refs[1 + 3 * n_layers]
    bproj_ref = refs[2 + 3 * n_layers]
    out_ref = refs[3 + 3 * n_layers]
    seq_ref = refs[4 + 3 * n_layers]

    Bp = out_ref.shape[0]
    T = x_ref.shape[0] // Bp
    H = seq_ref.shape[1]

    def run_layer(inp2d_bf16, wih_t_ref, whh_t_ref, b_ref, write_seq):
        # Hoisted input projection for all timesteps: one big MXU matmul.
        gx = jnp.dot(inp2d_bf16, wih_t_ref[...],
                     preferred_element_type=jnp.float32) + b_ref[...]   # (T*Bp, 4H)
        whh_t = whh_t_ref[...]                                          # (H, 4H) bf16
        h = jnp.zeros((Bp, H), jnp.float32)
        c = jnp.zeros((Bp, H), jnp.float32)
        # Fully unrolled time loop (T is a compile-time constant).
        for t in range(T):
            g = gx[t * Bp:(t + 1) * Bp, :] + jnp.dot(
                h.astype(jnp.bfloat16), whh_t,
                preferred_element_type=jnp.float32)                     # (Bp, 4H)
            # Gates pre-reordered to [i, f, o, g]: sigmoid on the first 3H
            # lanes, tanh on the last H lanes (2 EUP pushes instead of 4).
            s = jax.nn.sigmoid(g[:, :3 * H])
            g_cell = jnp.tanh(g[:, 3 * H:])
            i_g = s[:, :H]
            f_g = s[:, H:2 * H]
            o_g = s[:, 2 * H:]
            c = f_g * c + i_g * g_cell
            h = o_g * jnp.tanh(c)
            if write_seq:
                seq_ref[t * Bp:(t + 1) * Bp, :] = h
        return h

    # Layer 0 reads x directly; deeper layers read the (reused) VMEM scratch.
    # Reuse of a single scratch buffer is safe because each layer's input
    # projection consumes the whole previous sequence BEFORE any overwrite.
    h_last = run_layer(x_ref[...], *layer_refs[0], write_seq=(n_layers > 1))
    for l in range(1, n_layers):
        inp = seq_ref[...].astype(jnp.bfloat16)
        h_last = run_layer(inp, *layer_refs[l], write_seq=(l < n_layers - 1))

    # Fused projection + L2 normalization epilogue (rsqrt on the EUP; eps for
    # zero-row safety — PyTorch would NaN here, we stay finite).
    y = jnp.dot(h_last.astype(jnp.bfloat16), wproj_ref[...],
                preferred_element_type=jnp.float32) + bproj_ref[...]    # (Bp, O)
    sumsq = jnp.sum(y * y, axis=1, keepdims=True)
    out_ref[...] = y * lax.rsqrt(sumsq + 1e-12)


# ------------------------------- wrapper ------------------------------------

_VMEM = pl.BlockSpec(memory_space=pltpu.MemorySpace.VMEM)


def lstm_embedder_forward(x, kparams):
    """x: (B, n_feats, T) in PyTorch layout; returns (B, out_size), unit-norm rows."""
    B, F, T = x.shape
    Bp = max(8, ((B + 7) // 8) * 8)                 # pad batch to f32 sublane count
    H = kparams["lstm"][0]["whh_t"].shape[0]
    O = kparams["wproj_t"].shape[1]

    x_t = jnp.transpose(x, (2, 0, 1)).astype(jnp.float32)     # (T, B, F)
    x_p = jnp.pad(x_t, ((0, 0), (0, Bp - B), (0, 0)))         # (T, Bp, F)
    x2d = x_p.reshape(T * Bp, F).astype(jnp.bfloat16)         # (T*Bp, F)

    args = [x2d]
    for layer in kparams["lstm"]:
        args += [layer["wih_t"], layer["whh_t"], layer["b"]]
    args += [kparams["wproj_t"], kparams["bproj"]]

    out = pl.pallas_call(
        fused_lstm_embedder_kernel,
        out_shape=jax.ShapeDtypeStruct((Bp, O), jnp.float32),
        in_specs=[_VMEM] * len(args),
        out_specs=_VMEM,
        scratch_shapes=[pltpu.VMEM((T * Bp, H), jnp.float32)],
        compiler_params=pltpu.CompilerParams(vmem_limit_bytes=32 * 1024 * 1024),
        # TODO(synk): for production batch sizes add a grid over batch with
        # dimension_semantics=("parallel",) so v7x's two TensorCores split it,
        # and tile the sequence/weights if they no longer fit v7x's 64 MiB VMEM.
    )(*args)
    return out[:B]                                   # drop padded batch rows


# --------------------------- parameter handling ------------------------------

def _reorder_ifgo_to_ifog(w):
    """Reorder leading-axis gate blocks from PyTorch's [i, f, g, o] to [i, f, o, g]."""
    H = w.shape[0] // 4
    return jnp.concatenate([w[:2 * H], w[3 * H:], w[2 * H:3 * H]], axis=0)


def prepare_params(params):
    """One-time conversion from PyTorch-layout params to kernel layout:
    gate reorder, transpose to (K, 4H), combine biases, cast weights to bf16."""
    kp = {"lstm": []}
    for layer in params["lstm"]:
        wih = _reorder_ifgo_to_ifog(layer["w_ih"])            # (4H, Fin)
        whh = _reorder_ifgo_to_ifog(layer["w_hh"])            # (4H, H)
        b = _reorder_ifgo_to_ifog(layer["b_ih"] + layer["b_hh"])
        kp["lstm"].append({
            "wih_t": jnp.transpose(wih).astype(jnp.bfloat16),  # (Fin, 4H)
            "whh_t": jnp.transpose(whh).astype(jnp.bfloat16),  # (H, 4H)
            "b": b.reshape(1, -1).astype(jnp.float32),         # (1, 4H)
        })
    kp["wproj_t"] = jnp.transpose(params["proj_w"]).astype(jnp.bfloat16)  # (H, O)
    kp["bproj"] = params["proj_b"].reshape(1, -1).astype(jnp.float32)     # (1, O)
    return kp


def init_params(key, n_feats, n_layers, hidden_size, out_size):
    """Matches the PyTorch module's init: xavier_normal_ weights, zero LSTM biases,
    default nn.Linear uniform init for the projection."""
    params = {"lstm": []}
    for layer in range(n_layers):
        in_size = n_feats if layer == 0 else hidden_size
        key, k1, k2 = jax.random.split(key, 3)
        std_ih = (2.0 / (in_size + 4 * hidden_size)) ** 0.5
        std_hh = (2.0 / (hidden_size + 4 * hidden_size)) ** 0.5
        params["lstm"].append({
            "w_ih": std_ih * jax.random.normal(k1, (4 * hidden_size, in_size), jnp.float32),
            "w_hh": std_hh * jax.random.normal(k2, (4 * hidden_size, hidden_size), jnp.float32),
            "b_ih": jnp.zeros((4 * hidden_size,), jnp.float32),
            "b_hh": jnp.zeros((4 * hidden_size,), jnp.float32),
        })
    key, kw, kb = jax.random.split(key, 3)
    bound = 1.0 / (hidden_size ** 0.5)
    params["proj_w"] = jax.random.uniform(kw, (out_size, hidden_size), jnp.float32,
                                          -bound, bound)
    params["proj_b"] = jax.random.uniform(kb, (out_size,), jnp.float32, -bound, bound)
    return params


# ---------------------------------- main ------------------------------------

if __name__ == "__main__":
    B, n_feats, T = 2, 8, 8
    n_layers, hidden_size, out_size = 3, 32, 16

    key = jax.random.PRNGKey(0)
    key, kx = jax.random.split(key)
    x = jax.random.normal(kx, (B, n_feats, T), jnp.float32)

    params = init_params(key, n_feats, n_layers, hidden_size, out_size)
    kparams = prepare_params(params)   # one-time layout prep (transpose/reorder/bf16)

    out = jax.jit(lstm_embedder_forward)(x, kparams)
    out = jax.block_until_ready(out)

    assert out.shape == (B, out_size)
    assert bool(jnp.all(jnp.isfinite(out)))
    # rows should be (approximately) unit-norm
    assert bool(jnp.allclose(jnp.linalg.norm(out, axis=1), 1.0, atol=1e-3))
    print("KERNEL_OK")
</pallas_src>

<mosaic_0001>
module attributes {stable_mosaic.version = 11 : i64} {
  func.func @fused_lstm_embedder_kernel(%arg0: memref<64x8xbf16, #tpu.memory_space<vmem>>, %arg1: memref<8x128xbf16, #tpu.memory_space<vmem>>, %arg2: memref<32x128xbf16, #tpu.memory_space<vmem>>, %arg3: memref<1x128xf32, #tpu.memory_space<vmem>>, %arg4: memref<32x128xbf16, #tpu.memory_space<vmem>>, %arg5: memref<32x128xbf16, #tpu.memory_space<vmem>>, %arg6: memref<1x128xf32, #tpu.memory_space<vmem>>, %arg7: memref<32x128xbf16, #tpu.memory_space<vmem>>, %arg8: memref<32x128xbf16, #tpu.memory_space<vmem>>, %arg9: memref<1x128xf32, #tpu.memory_space<vmem>>, %arg10: memref<32x16xbf16, #tpu.memory_space<vmem>>, %arg11: memref<1x16xf32, #tpu.memory_space<vmem>>, %arg12: memref<8x16xf32, #tpu.memory_space<vmem>>, %arg13: memref<64x32xf32, #tpu.memory_space<vmem>>) attributes {dimension_semantics = [], scalar_prefetch = 0 : i64, scratch_operands = 1 : i64, tpu.core_type = #tpu.core_type<tc>} {
    %c0 = arith.constant 0 : index
    %c0_0 = arith.constant 0 : index
    %0 = vector.load %arg0[%c0, %c0_0] : memref<64x8xbf16, #tpu.memory_space<vmem>>, vector<64x8xbf16>
    %c0_1 = arith.constant 0 : index
    %c0_2 = arith.constant 0 : index
    %1 = vector.load %arg1[%c0_1, %c0_2] : memref<8x128xbf16, #tpu.memory_space<vmem>>, vector<8x128xbf16>
    %cst = arith.constant dense<0.000000e+00> : vector<64x128xf32>
    %2 = tpu.matmul %0, %1, %cst {dimension_numbers = #tpu.dot_dimension_numbers<[1], [0], [0], [1], [0, 0, 1, 1], [], []>} : vector<64x8xbf16>, vector<8x128xbf16>, vector<64x128xf32> -> vector<64x128xf32>
    %c0_3 = arith.constant 0 : index
    %c0_4 = arith.constant 0 : index
    %3 = vector.load %arg3[%c0_3, %c0_4] : memref<1x128xf32, #tpu.memory_space<vmem>>, vector<1x128xf32>
    %4 = vector.broadcast %3 : vector<1x128xf32> to vector<64x128xf32>
    %5 = arith.addf %2, %4 : vector<64x128xf32>
    %c0_5 = arith.constant 0 : index
    %c0_6 = arith.constant 0 : index
    %6 = vector.load %arg2[%c0_5, %c0_6] : memref<32x128xbf16, #tpu.memory_space<vmem>>, vector<32x128xbf16>
    %cst_7 = arith.constant 0.000000e+00 : f32
    %7 = vector.broadcast %cst_7 : f32 to vector<8x32xf32>
    %cst_8 = arith.constant 0.000000e+00 : f32
    %8 = vector.broadcast %cst_8 : f32 to vector<8x32xf32>
    %9 = vector.extract_strided_slice %5 {offsets = [0, 0], sizes = [8, 128], strides = [1, 1]} : vector<64x128xf32> to vector<8x128xf32>
    %10 = arith.truncf %7 : vector<8x32xf32> to vector<8x32xbf16>
    %cst_9 = arith.constant dense<0.000000e+00> : vector<8x128xf32>
    %11 = tpu.matmul %10, %6, %cst_9 {dimension_numbers = #tpu.dot_dimension_numbers<[1], [0], [0], [1], [0, 0, 1, 1], [], []>} : vector<8x32xbf16>, vector<32x128xbf16>, vector<8x128xf32> -> vector<8x128xf32>
    %12 = arith.addf %9, %11 : vector<8x128xf32>
    %13 = vector.extract_strided_slice %12 {offsets = [0, 0], sizes = [8, 96], strides = [1, 1]} : vector<8x128xf32> to vector<8x96xf32>
    %14 = arith.negf %13 : vector<8x96xf32>
    %15 = math.exp %14 : vector<8x96xf32>
    %cst_10 = arith.constant 1.000000e+00 : f32
    %16 = vector.broadcast %cst_10 : f32 to vector<8x96xf32>
    %17 = arith.addf %16, %15 : vector<8x96xf32>
    %18 = arith.divf %16, %17 : vector<8x96xf32>
    %19 = vector.extract_strided_slice %12 {offsets = [0, 96], sizes = [8, 32], strides = [1, 1]} : vector<8x128xf32> to vector<8x32xf32>
    %20 = math.tanh %19 : vector<8x32xf32>
    %21 = vector.extract_strided_slice %18 {offsets = [0, 0], sizes = [8, 32], strides = [1, 1]} : vector<8x96xf32> to vector<8x32xf32>
    %22 = vector.extract_strided_slice %18 {offsets = [0, 32], sizes = [8, 32], strides = [1, 1]} : vector<8x96xf32> to vector<8x32xf32>
    %23 = vector.extract_strided_slice %18 {offsets = [0, 64], sizes = [8, 32], strides = [1, 1]} : vector<8x96xf32> to vector<8x32xf32>
    %24 = arith.mulf %22, %8 : vector<8x32xf32>
    %25 = arith.mulf %21, %20 : vector<8x32xf32>
    %26 = arith.addf %24, %25 : vector<8x32xf32>
    %27 = math.tanh %26 : vector<8x32xf32>
    %28 = arith.mulf %23, %27 : vector<8x32xf32>
    %c0_11 = arith.constant 0 : index
    %c0_12 = arith.constant 0 : index
    %29 = vector.load %arg13[%c0_11, %c0_12] : memref<64x32xf32, #tpu.memory_space<vmem>>, vector<8x32xf32>
    tpu.vector_store %arg13[%c0_11, %c0_12], %28 {strides = array<i32>} : memref<64x32xf32, #tpu.memory_space<vmem>>, vector<8x32xf32>,
    %30 = vector.extract_strided_slice %5 {offsets = [8, 0], sizes = [8, 128], strides = [1, 1]} : vector<64x128xf32> to vector<8x128xf32>
    %31 = arith.truncf %28 : vector<8x32xf32> to vector<8x32xbf16>
    %cst_13 = arith.constant dense<0.000000e+00> : vector<8x128xf32>
    %32 = tpu.matmul %31, %6, %cst_13 {dimension_numbers = #tpu.dot_dimension_numbers<[1], [0], [0], [1], [0, 0, 1, 1], [], []>} : vector<8x32xbf16>, vector<32x128xbf16>, vector<8x128xf32> -> vector<8x128xf32>
    %33 = arith.addf %30, %32 : vector<8x128xf32>
    %34 = vector.extract_strided_slice %33 {offsets = [0, 0], sizes = [8, 96], strides = [1, 1]} : vector<8x128xf32> to vector<8x96xf32>
    %35 = arith.negf %34 : vector<8x96xf32>
    %36 = math.exp %35 : vector<8x96xf32>
    %cst_14 = arith.constant 1.000000e+00 : f32
    %37 = vector.broadcast %cst_14 : f32 to vector<8x96xf32>
    %38 = arith.addf %37, %36 : vector<8x96xf32>
    %39 = arith.divf %37, %38 : vector<8x96xf32>
    %40 = vector.extract_strided_slice %33 {offsets = [0, 96], sizes = [8, 32], strides = [1, 1]} : vector<8x128xf32> to vector<8x32xf32>
    %41 = math.tanh %40 : vector<8x32xf32>
    %42 = vector.extract_strided_slice %39 {offsets = [0, 0], sizes = [8, 32], strides = [1, 1]} : vector<8x96xf32> to vector<8x32xf32>
    %43 = vector.extract_strided_slice %39 {offsets = [0, 32], sizes = [8, 32], strides = [1, 1]} : vector<8x96xf32> to vector<8x32xf32>
    %44 = vector.extract_strided_slice %39 {offsets = [0, 64], sizes = [8, 32], strides = [1, 1]} : vector<8x96xf32> to vector<8x32xf32>
    %45 = arith.mulf %43, %26 : vector<8x32xf32>
    %46 = arith.mulf %42, %41 : vector<8x32xf32>
    %47 = arith.addf %45, %46 : vector<8x32xf32>
    %48 = math.tanh %47 : vector<8x32xf32>
    %49 = arith.mulf %44, %48 : vector<8x32xf32>
    %c8 = arith.constant 8 : index
    %c0_15 = arith.constant 0 : index
    %50 = vector.load %arg13[%c8, %c0_15] : memref<64x32xf32, #tpu.memory_space<vmem>>, vector<8x32xf32>
    tpu.vector_store %arg13[%c8, %c0_15], %49 {strides = array<i32>} : memref<64x32xf32, #tpu.memory_space<vmem>>, vector<8x32xf32>,
    %51 = vector.extract_strided_slice %5 {offsets = [16, 0], sizes = [8, 128], strides = [1, 1]} : vector<64x128xf32> to vector<8x128xf32>
    %52 = arith.truncf %49 : vector<8x32xf32> to vector<8x32xbf16>
    %cst_16 = arith.constant dense<0.000000e+00> : vector<8x128xf32>
    %53 = tpu.matmul %52, %6, %cst_16 {dimension_numbers = #tpu.dot_dimension_numbers<[1], [0], [0], [1], [0, 0, 1, 1], [], []>} : vector<8x32xbf16>, vector<32x128xbf16>, vector<8x128xf32> -> vector<8x128xf32>
    %54 = arith.addf %51, %53 : vector<8x128xf32>
    %55 = vector.extract_strided_slice %54 {offsets = [0, 0], sizes = [8, 96], strides = [1, 1]} : vector<8x128xf32> to vector<8x96xf32>
    %56 = arith.negf %55 : vector<8x96xf32>
    %57 = math.exp %56 : vector<8x96xf32>
    %cst_17 = arith.constant 1.000000e+00 : f32
    %58 = vector.broadcast %cst_17 : f32 to vector<8x96xf32>
    %59 = arith.addf %58, %57 : vector<8x96xf32>
    %60 = arith.divf %58, %59 : vector<8x96xf32>
    %61 = vector.extract_strided_slice %54 {offsets = [0, 96], sizes = [8, 32], strides = [1, 1]} : vector<8x128xf32> to vector<8x32xf32>
    %62 = math.tanh %61 : vector<8x32xf32>
    %63 = vector.extract_strided_slice %60 {offsets = [0, 0], sizes = [8, 32], strides = [1, 1]} : vector<8x96xf32> to vector<8x32xf32>
    %64 = vector.extract_strided_slice %60 {offsets = [0, 32], sizes = [8, 32], strides = [1, 1]} : vector<8x96xf32> to vector<8x32xf32>
    %65 = vector.extract_strided_slice %60 {offsets = [0, 64], sizes = [8, 32], strides = [1, 1]} : vector<8x96xf32> to vector<8x32xf32>
    %66 = arith.mulf %64, %47 : vector<8x32xf32>
    %67 = arith.mulf %63, %62 : vector<8x32xf32>
    %68 = arith.addf %66, %67 : vector<8x32xf32>
    %69 = math.tanh %68 : vector<8x32xf32>
    %70 = arith.mulf %65, %69 : vector<8x32xf32>
    %c16 = arith.constant 16 : index
    %c0_18 = arith.constant 0 : index
    %71 = vector.load %arg13[%c16, %c0_18] : memref<64x32xf32, #tpu.memory_space<vmem>>, vector<8x32xf32>
    tpu.vector_store %arg13[%c16, %c0_18], %70 {strides = array<i32>} : memref<64x32xf32, #tpu.memory_space<vmem>>, vector<8x32xf32>,
    %72 = vector.extract_strided_slice %5 {offsets = [24, 0], sizes = [8, 128], strides = [1, 1]} : vector<64x128xf32> to vector<8x128xf32>
    %73 = arith.truncf %70 : vector<8x32xf32> to vector<8x32xbf16>
    %cst_19 = arith.constant dense<0.000000e+00> : vector<8x128xf32>
    %74 = tpu.matmul %73, %6, %cst_19 {dimension_numbers = #tpu.dot_dimension_numbers<[1], [0], [0], [1], [0, 0, 1, 1], [], []>} : vector<8x32xbf16>, vector<32x128xbf16>, vector<8x128xf32> -> vector<8x128xf32>
    %75 = arith.addf %72, %74 : vector<8x128xf32>
    %76 = vector.extract_strided_slice %75 {offsets = [0, 0], sizes = [8, 96], strides = [1, 1]} : vector<8x128xf32> to vector<8x96xf32>
    %77 = arith.negf %76 : vector<8x96xf32>
    %78 = math.exp %77 : vector<8x96xf32>
    %cst_20 = arith.constant 1.000000e+00 : f32
    %79 = vector.broadcast %cst_20 : f32 to vector<8x96xf32>
    %80 = arith.addf %79, %78 : vector<8x96xf32>
    %81 = arith.divf %79, %80 : vector<8x96xf32>
    %82 = vector.extract_strided_slice %75 {offsets = [0, 96], sizes = [8, 32], strides = [1, 1]} : vector<8x128xf32> to vector<8x32xf32>
    %83 = math.tanh %82 : vector<8x32xf32>
    %84 = vector.extract_strided_slice %81 {offsets = [0, 0], sizes = [8, 32], strides = [1, 1]} : vector<8x96xf32> to vector<8x32xf32>
    %85 = vector.extract_strided_slice %81 {offsets = [0, 32], sizes = [8, 32], strides = [1, 1]} : vector<8x96xf32> to vector<8x32xf32>
    %86 = vector.extract_strided_slice %81 {offsets = [0, 64], sizes = [8, 32], strides = [1, 1]} : vector<8x96xf32> to vector<8x32xf32>
    %87 = arith.mulf %85, %68 : vector<8x32xf32>
    %88 = arith.mulf %84, %83 : vector<8x32xf32>
    %89 = arith.addf %87, %88 : vector<8x32xf32>
    %90 = math.tanh %89 : vector<8x32xf32>
    %91 = arith.mulf %86, %90 : vector<8x32xf32>
    %c24 = arith.constant 24 : index
    %c0_21 = arith.constant 0 : index
    %92 = vector.load %arg13[%c24, %c0_21] : memref<64x32xf32, #tpu.memory_space<vmem>>, vector<8x32xf32>
    tpu.vector_store %arg13[%c24, %c0_21], %91 {strides = array<i32>} : memref<64x32xf32, #tpu.memory_space<vmem>>, vector<8x32xf32>,
    %93 = vector.extract_strided_slice %5 {offsets = [32, 0], sizes = [8, 128], strides = [1, 1]} : vector<64x128xf32> to vector<8x128xf32>
    %94 = arith.truncf %91 : vector<8x32xf32> to vector<8x32xbf16>
    %cst_22 = arith.constant dense<0.000000e+00> : vector<8x128xf32>
    %95 = tpu.matmul %94, %6, %cst_22 {dimension_numbers = #tpu.dot_dimension_numbers<[1], [0], [0], [1], [0, 0, 1, 1], [], []>} : vector<8x32xbf16>, vector<32x128xbf16>, vector<8x128xf32> -> vector<8x128xf32>
    %96 = arith.addf %93, %95 : vector<8x128xf32>
    %97 = vector.extract_strided_slice %96 {offsets = [0, 0], sizes = [8, 96], strides = [1, 1]} : vector<8x128xf32> to vector<8x96xf32>
    %98 = arith.negf %97 : vector<8x96xf32>
    %99 = math.exp %98 : vector<8x96xf32>
    %cst_23 = arith.constant 1.000000e+00 : f32
    %100 = vector.broadcast %cst_23 : f32 to vector<8x96xf32>
    %101 = arith.addf %100, %99 : vector<8x96xf32>
    %102 = arith.divf %100, %101 : vector<8x96xf32>
    %103 = vector.extract_strided_slice %96 {offsets = [0, 96], sizes = [8, 32], strides = [1, 1]} : vector<8x128xf32> to vector<8x32xf32>
    %104 = math.tanh %103 : vector<8x32xf32>
    %105 = vector.extract_strided_slice %102 {offsets = [0, 0], sizes = [8, 32], strides = [1, 1]} : vector<8x96xf32> to vector<8x32xf32>
    %106 = vector.extract_strided_slice %102 {offsets = [0, 32], sizes = [8, 32], strides = [1, 1]} : vector<8x96xf32> to vector<8x32xf32>
    %107 = vector.extract_strided_slice %102 {offsets = [0, 64], sizes = [8, 32], strides = [1, 1]} : vector<8x96xf32> to vector<8x32xf32>
    %108 = arith.mulf %106, %89 : vector<8x32xf32>
    %109 = arith.mulf %105, %104 : vector<8x32xf32>
    %110 = arith.addf %108, %109 : vector<8x32xf32>
    %111 = math.tanh %110 : vector<8x32xf32>
    %112 = arith.mulf %107, %111 : vector<8x32xf32>
    %c32 = arith.constant 32 : index
    %c0_24 = arith.constant 0 : index
    %113 = vector.load %arg13[%c32, %c0_24] : memref<64x32xf32, #tpu.memory_space<vmem>>, vector<8x32xf32>
    tpu.vector_store %arg13[%c32, %c0_24], %112 {strides = array<i32>} : memref<64x32xf32, #tpu.memory_space<vmem>>, vector<8x32xf32>,
    %114 = vector.extract_strided_slice %5 {offsets = [40, 0], sizes = [8, 128], strides = [1, 1]} : vector<64x128xf32> to vector<8x128xf32>
    %115 = arith.truncf %112 : vector<8x32xf32> to vector<8x32xbf16>
    %cst_25 = arith.constant dense<0.000000e+00> : vector<8x128xf32>
    %116 = tpu.matmul %115, %6, %cst_25 {dimension_numbers = #tpu.dot_dimension_numbers<[1], [0], [0], [1], [0, 0, 1, 1], [], []>} : vector<8x32xbf16>, vector<32x128xbf16>, vector<8x128xf32> -> vector<8x128xf32>
    %117 = arith.addf %114, %116 : vector<8x128xf32>
    %118 = vector.extract_strided_slice %117 {offsets = [0, 0], sizes = [8, 96], strides = [1, 1]} : vector<8x128xf32> to vector<8x96xf32>
    %119 = arith.negf %118 : vector<8x96xf32>
    %120 = math.exp %119 : vector<8x96xf32>
    %cst_26 = arith.constant 1.000000e+00 : f32
    %121 = vector.broadcast %cst_26 : f32 to vector<8x96xf32>
    %122 = arith.addf %121, %120 : vector<8x96xf32>
    %123 = arith.divf %121, %122 : vector<8x96xf32>
    %124 = vector.extract_strided_slice %117 {offsets = [0, 96], sizes = [8, 32], strides = [1, 1]} : vector<8x128xf32> to vector<8x32xf32>
    %125 = math.tanh %124 : vector<8x32xf32>
    %126 = vector.extract_strided_slice %123 {offsets = [0, 0], sizes = [8, 32], strides = [1, 1]} : vector<8x96xf32> to vector<8x32xf32>
    %127 = vector.extract_strided_slice %123 {offsets = [0, 32], sizes = [8, 32], strides = [1, 1]} : vector<8x96xf32> to vector<8x32xf32>
    %128 = vector.extract_strided_slice %123 {offsets = [0, 64], sizes = [8, 32], strides = [1, 1]} : vector<8x96xf32> to vector<8x32xf32>
    %129 = arith.mulf %127, %110 : vector<8x32xf32>
    %130 = arith.mulf %126, %125 : vector<8x32xf32>
    %131 = arith.addf %129, %130 : vector<8x32xf32>
    %132 = math.tanh %131 : vector<8x32xf32>
    %133 = arith.mulf %128, %132 : vector<8x32xf32>
    %c40 = arith.constant 40 : index
    %c0_27 = arith.constant 0 : index
    %134 = vector.load %arg13[%c40, %c0_27] : memref<64x32xf32, #tpu.memory_space<vmem>>, vector<8x32xf32>
    tpu.vector_store %arg13[%c40, %c0_27], %133 {strides = array<i32>} : memref<64x32xf32, #tpu.memory_space<vmem>>, vector<8x32xf32>,
    %135 = vector.extract_strided_slice %5 {offsets = [48, 0], sizes = [8, 128], strides = [1, 1]} : vector<64x128xf32> to vector<8x128xf32>
    %136 = arith.truncf %133 : vector<8x32xf32> to vector<8x32xbf16>
    %cst_28 = arith.constant dense<0.000000e+00> : vector<8x128xf32>
    %137 = tpu.matmul %136, %6, %cst_28 {dimension_numbers = #tpu.dot_dimension_numbers<[1], [0], [0], [1], [0, 0, 1, 1], [], []>} : vector<8x32xbf16>, vector<32x128xbf16>, vector<8x128xf32> -> vector<8x128xf32>
    %138 = arith.addf %135, %137 : vector<8x128xf32>
    %139 = vector.extract_strided_slice %138 {offsets = [0, 0], sizes = [8, 96], strides = [1, 1]} : vector<8x128xf32> to vector<8x96xf32>
    %140 = arith.negf %139 : vector<8x96xf32>
    %141 = math.exp %140 : vector<8x96xf32>
    %cst_29 = arith.constant 1.000000e+00 : f32
    %142 = vector.broadcast %cst_29 : f32 to vector<8x96xf32>
    %143 = arith.addf %142, %141 : vector<8x96xf32>
    %144 = arith.divf %142, %143 : vector<8x96xf32>
    %145 = vector.extract_strided_slice %138 {offsets = [0, 96], sizes = [8, 32], strides = [1, 1]} : vector<8x128xf32> to vector<8x32xf32>
    %146 = math.tanh %145 : vector<8x32xf32>
    %147 = vector.extract_strided_slice %144 {offsets = [0, 0], sizes = [8, 32], strides = [1, 1]} : vector<8x96xf32> to vector<8x32xf32>
    %148 = vector.extract_strided_slice %144 {offsets = [0, 32], sizes = [8, 32], strides = [1, 1]} : vector<8x96xf32> to vector<8x32xf32>
    %149 = vector.extract_strided_slice %144 {offsets = [0, 64], sizes = [8, 32], strides = [1, 1]} : vector<8x96xf32> to vector<8x32xf32>
    %150 = arith.mulf %148, %131 : vector<8x32xf32>
    %151 = arith.mulf %147, %146 : vector<8x32xf32>
    %152 = arith.addf %150, %151 : vector<8x32xf32>
    %153 = math.tanh %152 : vector<8x32xf32>
    %154 = arith.mulf %149, %153 : vector<8x32xf32>
    %c48 = arith.constant 48 : index
    %c0_30 = arith.constant 0 : index
    %155 = vector.load %arg13[%c48, %c0_30] : memref<64x32xf32, #tpu.memory_space<vmem>>, vector<8x32xf32>
    tpu.vector_store %arg13[%c48, %c0_30], %154 {strides = array<i32>} : memref<64x32xf32, #tpu.memory_space<vmem>>, vector<8x32xf32>,
    %156 = vector.extract_strided_slice %5 {offsets = [56, 0], sizes = [8, 128], strides = [1, 1]} : vector<64x128xf32> to vector<8x128xf32>
    %157 = arith.truncf %154 : vector<8x32xf32> to vector<8x32xbf16>
    %cst_31 = arith.constant dense<0.000000e+00> : vector<8x128xf32>
    %158 = tpu.matmul %157, %6, %cst_31 {dimension_numbers = #tpu.dot_dimension_numbers<[1], [0], [0], [1], [0, 0, 1, 1], [], []>} : vector<8x32xbf16>, vector<32x128xbf16>, vector<8x128xf32> -> vector<8x128xf32>
    %159 = arith.addf %156, %158 : vector<8x128xf32>
    %160 = vector.extract_strided_slice %159 {offsets = [0, 0], sizes = [8, 96], strides = [1, 1]} : vector<8x128xf32> to vector<8x96xf32>
    %161 = arith.negf %160 : vector<8x96xf32>
    %162 = math.exp %161 : vector<8x96xf32>
    %cst_32 = arith.constant 1.000000e+00 : f32
    %163 = vector.broadcast %cst_32 : f32 to vector<8x96xf32>
    %164 = arith.addf %163, %162 : vector<8x96xf32>
    %165 = arith.divf %163, %164 : vector<8x96xf32>
    %166 = vector.extract_strided_slice %159 {offsets = [0, 96], sizes = [8, 32], strides = [1, 1]} : vector<8x128xf32> to vector<8x32xf32>
    %167 = math.tanh %166 : vector<8x32xf32>
    %168 = vector.extract_strided_slice %165 {offsets = [0, 0], sizes = [8, 32], strides = [1, 1]} : vector<8x96xf32> to vector<8x32xf32>
    %169 = vector.extract_strided_slice %165 {offsets = [0, 32], sizes = [8, 32], strides = [1, 1]} : vector<8x96xf32> to vector<8x32xf32>
    %170 = vector.extract_strided_slice %165 {offsets = [0, 64], sizes = [8, 32], strides = [1, 1]} : vector<8x96xf32> to vector<8x32xf32>
    %171 = arith.mulf %169, %152 : vector<8x32xf32>
    %172 = arith.mulf %168, %167 : vector<8x32xf32>
    %173 = arith.addf %171, %172 : vector<8x32xf32>
    %174 = math.tanh %173 : vector<8x32xf32>
    %175 = arith.mulf %170, %174 : vector<8x32xf32>
    %c56 = arith.constant 56 : index
    %c0_33 = arith.constant 0 : index
    %176 = vector.load %arg13[%c56, %c0_33] : memref<64x32xf32, #tpu.memory_space<vmem>>, vector<8x32xf32>
    tpu.vector_store %arg13[%c56, %c0_33], %175 {strides = array<i32>} : memref<64x32xf32, #tpu.memory_space<vmem>>, vector<8x32xf32>,
    %c0_34 = arith.constant 0 : index
    %c0_35 = arith.constant 0 : index
    %177 = vector.load %arg13[%c0_34, %c0_35] : memref<64x32xf32, #tpu.memory_space<vmem>>, vector<64x32xf32>
    %178 = arith.truncf %177 : vector<64x32xf32> to vector<64x32xbf16>
    %c0_36 = arith.constant 0 : index
    %c0_37 = arith.constant 0 : index
    %179 = vector.load %arg4[%c0_36, %c0_37] : memref<32x128xbf16, #tpu.memory_space<vmem>>, vector<32x128xbf16>
    %cst_38 = arith.constant dense<0.000000e+00> : vector<64x128xf32>
    %180 = tpu.matmul %178, %179, %cst_38 {dimension_numbers = #tpu.dot_dimension_numbers<[1], [0], [0], [1], [0, 0, 1, 1], [], []>} : vector<64x32xbf16>, vector<32x128xbf16>, vector<64x128xf32> -> vector<64x128xf32>
    %c0_39 = arith.constant 0 : index
    %c0_40 = arith.constant 0 : index
    %181 = vector.load %arg6[%c0_39, %c0_40] : memref<1x128xf32, #tpu.memory_space<vmem>>, vector<1x128xf32>
    %182 = vector.broadcast %181 : vector<1x128xf32> to vector<64x128xf32>
    %183 = arith.addf %180, %182 : vector<64x128xf32>
    %c0_41 = arith.constant 0 : index
    %c0_42 = arith.constant 0 : index
    %184 = vector.load %arg5[%c0_41, %c0_42] : memref<32x128xbf16, #tpu.memory_space<vmem>>, vector<32x128xbf16>
    %cst_43 = arith.constant 0.000000e+00 : f32
    %185 = vector.broadcast %cst_43 : f32 to vector<8x32xf32>
    %cst_44 = arith.constant 0.000000e+00 : f32
    %186 = vector.broadcast %cst_44 : f32 to vector<8x32xf32>
    %187 = vector.extract_strided_slice %183 {offsets = [0, 0], sizes = [8, 128], strides = [1, 1]} : vector<64x128xf32> to vector<8x128xf32>
    %188 = arith.truncf %185 : vector<8x32xf32> to vector<8x32xbf16>
    %cst_45 = arith.constant dense<0.000000e+00> : vector<8x128xf32>
    %189 = tpu.matmul %188, %184, %cst_45 {dimension_numbers = #tpu.dot_dimension_numbers<[1], [0], [0], [1], [0, 0, 1, 1], [], []>} : vector<8x32xbf16>, vector<32x128xbf16>, vector<8x128xf32> -> vector<8x128xf32>
    %190 = arith.addf %187, %189 : vector<8x128xf32>
    %191 = vector.extract_strided_slice %190 {offsets = [0, 0], sizes = [8, 96], strides = [1, 1]} : vector<8x128xf32> to vector<8x96xf32>
    %192 = arith.negf %191 : vector<8x96xf32>
    %193 = math.exp %192 : vector<8x96xf32>
    %cst_46 = arith.constant 1.000000e+00 : f32
    %194 = vector.broadcast %cst_46 : f32 to vector<8x96xf32>
    %195 = arith.addf %194, %193 : vector<8x96xf32>
    %196 = arith.divf %194, %195 : vector<8x96xf32>
    %197 = vector.extract_strided_slice %190 {offsets = [0, 96], sizes = [8, 32], strides = [1, 1]} : vector<8x128xf32> to vector<8x32xf32>
    %198 = math.tanh %197 : vector<8x32xf32>
    %199 = vector.extract_strided_slice %196 {offsets = [0, 0], sizes = [8, 32], strides = [1, 1]} : vector<8x96xf32> to vector<8x32xf32>
    %200 = vector.extract_strided_slice %196 {offsets = [0, 32], sizes = [8, 32], strides = [1, 1]} : vector<8x96xf32> to vector<8x32xf32>
    %201 = vector.extract_strided_slice %196 {offsets = [0, 64], sizes = [8, 32], strides = [1, 1]} : vector<8x96xf32> to vector<8x32xf32>
    %202 = arith.mulf %200, %186 : vector<8x32xf32>
    %203 = arith.mulf %199, %198 : vector<8x32xf32>
    %204 = arith.addf %202, %203 : vector<8x32xf32>
    %205 = math.tanh %204 : vector<8x32xf32>
    %206 = arith.mulf %201, %205 : vector<8x32xf32>
    %c0_47 = arith.constant 0 : index
    %c0_48 = arith.constant 0 : index
    %207 = vector.load %arg13[%c0_47, %c0_48] : memref<64x32xf32, #tpu.memory_space<vmem>>, vector<8x32xf32>
    tpu.vector_store %arg13[%c0_47, %c0_48], %206 {strides = array<i32>} : memref<64x32xf32, #tpu.memory_space<vmem>>, vector<8x32xf32>,
    %208 = vector.extract_strided_slice %183 {offsets = [8, 0], sizes = [8, 128], strides = [1, 1]} : vector<64x128xf32> to vector<8x128xf32>
    %209 = arith.truncf %206 : vector<8x32xf32> to vector<8x32xbf16>
    %cst_49 = arith.constant dense<0.000000e+00> : vector<8x128xf32>
    %210 = tpu.matmul %209, %184, %cst_49 {dimension_numbers = #tpu.dot_dimension_numbers<[1], [0], [0], [1], [0, 0, 1, 1], [], []>} : vector<8x32xbf16>, vector<32x128xbf16>, vector<8x128xf32> -> vector<8x128xf32>
    %211 = arith.addf %208, %210 : vector<8x128xf32>
    %212 = vector.extract_strided_slice %211 {offsets = [0, 0], sizes = [8, 96], strides = [1, 1]} : vector<8x128xf32> to vector<8x96xf32>
    %213 = arith.negf %212 : vector<8x96xf32>
    %214 = math.exp %213 : vector<8x96xf32>
    %cst_50 = arith.constant 1.000000e+00 : f32
    %215 = vector.broadcast %cst_50 : f32 to vector<8x96xf32>
    %216 = arith.addf %215, %214 : vector<8x96xf32>
    %217 = arith.divf %215, %216 : vector<8x96xf32>
    %218 = vector.extract_strided_slice %211 {offsets = [0, 96], sizes = [8, 32], strides = [1, 1]} : vector<8x128xf32> to vector<8x32xf32>
    %219 = math.tanh %218 : vector<8x32xf32>
    %220 = vector.extract_strided_slice %217 {offsets = [0, 0], sizes = [8, 32], strides = [1, 1]} : vector<8x96xf32> to vector<8x32xf32>
    %221 = vector.extract_strided_slice %217 {offsets = [0, 32], sizes = [8, 32], strides = [1, 1]} : vector<8x96xf32> to vector<8x32xf32>
    %222 = vector.extract_strided_slice %217 {offsets = [0, 64], sizes = [8, 32], strides = [1, 1]} : vector<8x96xf32> to vector<8x32xf32>
    %223 = arith.mulf %221, %204 : vector<8x32xf32>
    %224 = arith.mulf %220, %219 : vector<8x32xf32>
    %225 = arith.addf %223, %224 : vector<8x32xf32>
    %226 = math.tanh %225 : vector<8x32xf32>
    %227 = arith.mulf %222, %226 : vector<8x32xf32>
    %c8_51 = arith.constant 8 : index
    %c0_52 = arith.constant 0 : index
    %228 = vector.load %arg13[%c8_51, %c0_52] : memref<64x32xf32, #tpu.memory_space<vmem>>, vector<8x32xf32>
    tpu.vector_store %arg13[%c8_51, %c0_52], %227 {strides = array<i32>} : memref<64x32xf32, #tpu.memory_space<vmem>>, vector<8x32xf32>,
    %229 = vector.extract_strided_slice %183 {offsets = [16, 0], sizes = [8, 128], strides = [1, 1]} : vector<64x128xf32> to vector<8x128xf32>
    %230 = arith.truncf %227 : vector<8x32xf32> to vector<8x32xbf16>
    %cst_53 = arith.constant dense<0.000000e+00> : vector<8x128xf32>
    %231 = tpu.matmul %230, %184, %cst_53 {dimension_numbers = #tpu.dot_dimension_numbers<[1], [0], [0], [1], [0, 0, 1, 1], [], []>} : vector<8x32xbf16>, vector<32x128xbf16>, vector<8x128xf32> -> vector<8x128xf32>
    %232 = arith.addf %229, %231 : vector<8x128xf32>
    %233 = vector.extract_strided_slice %232 {offsets = [0, 0], sizes = [8, 96], strides = [1, 1]} : vector<8x128xf32> to vector<8x96xf32>
    %234 = arith.negf %233 : vector<8x96xf32>
    %235 = math.exp %234 : vector<8x96xf32>
    %cst_54 = arith.constant 1.000000e+00 : f32
    %236 = vector.broadcast %cst_54 : f32 to vector<8x96xf32>
    %237 = arith.addf %236, %235 : vector<8x96xf32>
    %238 = arith.divf %236, %237 : vector<8x96xf32>
    %239 = vector.extract_strided_slice %232 {offsets = [0, 96], sizes = [8, 32], strides = [1, 1]} : vector<8x128xf32> to vector<8x32xf32>
    %240 = math.tanh %239 : vector<8x32xf32>
    %241 = vector.extract_strided_slice %238 {offsets = [0, 0], sizes = [8, 32], strides = [1, 1]} : vector<8x96xf32> to vector<8x32xf32>
    %242 = vector.extract_strided_slice %238 {offsets = [0, 32], sizes = [8, 32], strides = [1, 1]} : vector<8x96xf32> to vector<8x32xf32>
    %243 = vector.extract_strided_slice %238 {offsets = [0, 64], sizes = [8, 32], strides = [1, 1]} : vector<8x96xf32> to vector<8x32xf32>
    %244 = arith.mulf %242, %225 : vector<8x32xf32>
    %245 = arith.mulf %241, %240 : vector<8x32xf32>
    %246 = arith.addf %244, %245 : vector<8x32xf32>
    %247 = math.tanh %246 : vector<8x32xf32>
    %248 = arith.mulf %243, %247 : vector<8x32xf32>
    %c16_55 = arith.constant 16 : index
    %c0_56 = arith.constant 0 : index
    %249 = vector.load %arg13[%c16_55, %c0_56] : memref<64x32xf32, #tpu.memory_space<vmem>>, vector<8x32xf32>
    tpu.vector_store %arg13[%c16_55, %c0_56], %248 {strides = array<i32>} : memref<64x32xf32, #tpu.memory_space<vmem>>, vector<8x32xf32>,
    %250 = vector.extract_strided_slice %183 {offsets = [24, 0], sizes = [8, 128], strides = [1, 1]} : vector<64x128xf32> to vector<8x128xf32>
    %251 = arith.truncf %248 : vector<8x32xf32> to vector<8x32xbf16>
    %cst_57 = arith.constant dense<0.000000e+00> : vector<8x128xf32>
    %252 = tpu.matmul %251, %184, %cst_57 {dimension_numbers = #tpu.dot_dimension_numbers<[1], [0], [0], [1], [0, 0, 1, 1], [], []>} : vector<8x32xbf16>, vector<32x128xbf16>, vector<8x128xf32> -> vector<8x128xf32>
    %253 = arith.addf %250, %252 : vector<8x128xf32>
    %254 = vector.extract_strided_slice %253 {offsets = [0, 0], sizes = [8, 96], strides = [1, 1]} : vector<8x128xf32> to vector<8x96xf32>
    %255 = arith.negf %254 : vector<8x96xf32>
    %256 = math.exp %255 : vector<8x96xf32>
    %cst_58 = arith.constant 1.000000e+00 : f32
    %257 = vector.broadcast %cst_58 : f32 to vector<8x96xf32>
    %258 = arith.addf %257, %256 : vector<8x96xf32>
    %259 = arith.divf %257, %258 : vector<8x96xf32>
    %260 = vector.extract_strided_slice %253 {offsets = [0, 96], sizes = [8, 32], strides = [1, 1]} : vector<8x128xf32> to vector<8x32xf32>
    %261 = math.tanh %260 : vector<8x32xf32>
    %262 = vector.extract_strided_slice %259 {offsets = [0, 0], sizes = [8, 32], strides = [1, 1]} : vector<8x96xf32> to vector<8x32xf32>
    %263 = vector.extract_strided_slice %259 {offsets = [0, 32], sizes = [8, 32], strides = [1, 1]} : vector<8x96xf32> to vector<8x32xf32>
    %264 = vector.extract_strided_slice %259 {offsets = [0, 64], sizes = [8, 32], strides = [1, 1]} : vector<8x96xf32> to vector<8x32xf32>
    %265 = arith.mulf %263, %246 : vector<8x32xf32>
    %266 = arith.mulf %262, %261 : vector<8x32xf32>
    %267 = arith.addf %265, %266 : vector<8x32xf32>
    %268 = math.tanh %267 : vector<8x32xf32>
    %269 = arith.mulf %264, %268 : vector<8x32xf32>
    %c24_59 = arith.constant 24 : index
    %c0_60 = arith.constant 0 : index
    %270 = vector.load %arg13[%c24_59, %c0_60] : memref<64x32xf32, #tpu.memory_space<vmem>>, vector<8x32xf32>
    tpu.vector_store %arg13[%c24_59, %c0_60], %269 {strides = array<i32>} : memref<64x32xf32, #tpu.memory_space<vmem>>, vector<8x32xf32>,
    %271 = vector.extract_strided_slice %183 {offsets = [32, 0], sizes = [8, 128], strides = [1, 1]} : vector<64x128xf32> to vector<8x128xf32>
    %272 = arith.truncf %269 : vector<8x32xf32> to vector<8x32xbf16>
    %cst_61 = arith.constant dense<0.000000e+00> : vector<8x128xf32>
    %273 = tpu.matmul %272, %184, %cst_61 {dimension_numbers = #tpu.dot_dimension_numbers<[1], [0], [0], [1], [0, 0, 1, 1], [], []>} : vector<8x32xbf16>, vector<32x128xbf16>, vector<8x128xf32> -> vector<8x128xf32>
    %274 = arith.addf %271, %273 : vector<8x128xf32>
    %275 = vector.extract_strided_slice %274 {offsets = [0, 0], sizes = [8, 96], strides = [1, 1]} : vector<8x128xf32> to vector<8x96xf32>
    %276 = arith.negf %275 : vector<8x96xf32>
    %277 = math.exp %276 : vector<8x96xf32>
    %cst_62 = arith.constant 1.000000e+00 : f32
    %278 = vector.broadcast %cst_62 : f32 to vector<8x96xf32>
    %279 = arith.addf %278, %277 : vector<8x96xf32>
    %280 = arith.divf %278, %279 : vector<8x96xf32>
    %281 = vector.extract_strided_slice %274 {offsets = [0, 96], sizes = [8, 32], strides = [1, 1]} : vector<8x128xf32> to vector<8x32xf32>
    %282 = math.tanh %281 : vector<8x32xf32>
    %283 = vector.extract_strided_slice %280 {offsets = [0, 0], sizes = [8, 32], strides = [1, 1]} : vector<8x96xf32> to vector<8x32xf32>
    %284 = vector.extract_strided_slice %280 {offsets = [0, 32], sizes = [8, 32], strides = [1, 1]} : vector<8x96xf32> to vector<8x32xf32>
    %285 = vector.extract_strided_slice %280 {offsets = [0, 64], sizes = [8, 32], strides = [1, 1]} : vector<8x96xf32> to vector<8x32xf32>
    %286 = arith.mulf %284, %267 : vector<8x32xf32>
    %287 = arith.mulf %283, %282 : vector<8x32xf32>
    %288 = arith.addf %286, %287 : vector<8x32xf32>
    %289 = math.tanh %288 : vector<8x32xf32>
    %290 = arith.mulf %285, %289 : vector<8x32xf32>
    %c32_63 = arith.constant 32 : index
    %c0_64 = arith.constant 0 : index
    %291 = vector.load %arg13[%c32_63, %c0_64] : memref<64x32xf32, #tpu.memory_space<vmem>>, vector<8x32xf32>
    tpu.vector_store %arg13[%c32_63, %c0_64], %290 {strides = array<i32>} : memref<64x32xf32, #tpu.memory_space<vmem>>, vector<8x32xf32>,
    %292 = vector.extract_strided_slice %183 {offsets = [40, 0], sizes = [8, 128], strides = [1, 1]} : vector<64x128xf32> to vector<8x128xf32>
    %293 = arith.truncf %290 : vector<8x32xf32> to vector<8x32xbf16>
    %cst_65 = arith.constant dense<0.000000e+00> : vector<8x128xf32>
    %294 = tpu.matmul %293, %184, %cst_65 {dimension_numbers = #tpu.dot_dimension_numbers<[1], [0], [0], [1], [0, 0, 1, 1], [], []>} : vector<8x32xbf16>, vector<32x128xbf16>, vector<8x128xf32> -> vector<8x128xf32>
    %295 = arith.addf %292, %294 : vector<8x128xf32>
    %296 = vector.extract_strided_slice %295 {offsets = [0, 0], sizes = [8, 96], strides = [1, 1]} : vector<8x128xf32> to vector<8x96xf32>
    %297 = arith.negf %296 : vector<8x96xf32>
    %298 = math.exp %297 : vector<8x96xf32>
    %cst_66 = arith.constant 1.000000e+00 : f32
    %299 = vector.broadcast %cst_66 : f32 to vector<8x96xf32>
    %300 = arith.addf %299, %298 : vector<8x96xf32>
    %301 = arith.divf %299, %300 : vector<8x96xf32>
    %302 = vector.extract_strided_slice %295 {offsets = [0, 96], sizes = [8, 32], strides = [1, 1]} : vector<8x128xf32> to vector<8x32xf32>
    %303 = math.tanh %302 : vector<8x32xf32>
    %304 = vector.extract_strided_slice %301 {offsets = [0, 0], sizes = [8, 32], strides = [1, 1]} : vector<8x96xf32> to vector<8x32xf32>
    %305 = vector.extract_strided_slice %301 {offsets = [0, 32], sizes = [8, 32], strides = [1, 1]} : vector<8x96xf32> to vector<8x32xf32>
    %306 = vector.extract_strided_slice %301 {offsets = [0, 64], sizes = [8, 32], strides = [1, 1]} : vector<8x96xf32> to vector<8x32xf32>
    %307 = arith.mulf %305, %288 : vector<8x32xf32>
    %308 = arith.mulf %304, %303 : vector<8x32xf32>
    %309 = arith.addf %307, %308 : vector<8x32xf32>
    %310 = math.tanh %309 : vector<8x32xf32>
    %311 = arith.mulf %306, %310 : vector<8x32xf32>
    %c40_67 = arith.constant 40 : index
    %c0_68 = arith.constant 0 : index
    %312 = vector.load %arg13[%c40_67, %c0_68] : memref<64x32xf32, #tpu.memory_space<vmem>>, vector<8x32xf32>
    tpu.vector_store %arg13[%c40_67, %c0_68], %311 {strides = array<i32>} : memref<64x32xf32, #tpu.memory_space<vmem>>, vector<8x32xf32>,
    %313 = vector.extract_strided_slice %183 {offsets = [48, 0], sizes = [8, 128], strides = [1, 1]} : vector<64x128xf32> to vector<8x128xf32>
    %314 = arith.truncf %311 : vector<8x32xf32> to vector<8x32xbf16>
    %cst_69 = arith.constant dense<0.000000e+00> : vector<8x128xf32>
    %315 = tpu.matmul %314, %184, %cst_69 {dimension_numbers = #tpu.dot_dimension_numbers<[1], [0], [0], [1], [0, 0, 1, 1], [], []>} : vector<8x32xbf16>, vector<32x128xbf16>, vector<8x128xf32> -> vector<8x128xf32>
    %316 = arith.addf %313, %315 : vector<8x128xf32>
    %317 = vector.extract_strided_slice %316 {offsets = [0, 0], sizes = [8, 96], strides = [1, 1]} : vector<8x128xf32> to vector<8x96xf32>
    %318 = arith.negf %317 : vector<8x96xf32>
    %319 = math.exp %318 : vector<8x96xf32>
    %cst_70 = arith.constant 1.000000e+00 : f32
    %320 = vector.broadcast %cst_70 : f32 to vector<8x96xf32>
    %321 = arith.addf %320, %319 : vector<8x96xf32>
    %322 = arith.divf %320, %321 : vector<8x96xf32>
    %323 = vector.extract_strided_slice %316 {offsets = [0, 96], sizes = [8, 32], strides = [1, 1]} : vector<8x128xf32> to vector<8x32xf32>
    %324 = math.tanh %323 : vector<8x32xf32>
    %325 = vector.extract_strided_slice %322 {offsets = [0, 0], sizes = [8, 32], strides = [1, 1]} : vector<8x96xf32> to vector<8x32xf32>
    %326 = vector.extract_strided_slice %322 {offsets = [0, 32], sizes = [8, 32], strides = [1, 1]} : vector<8x96xf32> to vector<8x32xf32>
    %327 = vector.extract_strided_slice %322 {offsets = [0, 64], sizes = [8, 32], strides = [1, 1]} : vector<8x96xf32> to vector<8x32xf32>
    %328 = arith.mulf %326, %309 : vector<8x32xf32>
    %329 = arith.mulf %325, %324 : vector<8x32xf32>
    %330 = arith.addf %328, %329 : vector<8x32xf32>
    %331 = math.tanh %330 : vector<8x32xf32>
    %332 = arith.mulf %327, %331 : vector<8x32xf32>
    %c48_71 = arith.constant 48 : index
    %c0_72 = arith.constant 0 : index
    %333 = vector.load %arg13[%c48_71, %c0_72] : memref<64x32xf32, #tpu.memory_space<vmem>>, vector<8x32xf32>
    tpu.vector_store %arg13[%c48_71, %c0_72], %332 {strides = array<i32>} : memref<64x32xf32, #tpu.memory_space<vmem>>, vector<8x32xf32>,
    %334 = vector.extract_strided_slice %183 {offsets = [56, 0], sizes = [8, 128], strides = [1, 1]} : vector<64x128xf32> to vector<8x128xf32>
    %335 = arith.truncf %332 : vector<8x32xf32> to vector<8x32xbf16>
    %cst_73 = arith.constant dense<0.000000e+00> : vector<8x128xf32>
    %336 = tpu.matmul %335, %184, %cst_73 {dimension_numbers = #tpu.dot_dimension_numbers<[1], [0], [0], [1], [0, 0, 1, 1], [], []>} : vector<8x32xbf16>, vector<32x128xbf16>, vector<8x128xf32> -> vector<8x128xf32>
    %337 = arith.addf %334, %336 : vector<8x128xf32>
    %338 = vector.extract_strided_slice %337 {offsets = [0, 0], sizes = [8, 96], strides = [1, 1]} : vector<8x128xf32> to vector<8x96xf32>
    %339 = arith.negf %338 : vector<8x96xf32>
    %340 = math.exp %339 : vector<8x96xf32>
    %cst_74 = arith.constant 1.000000e+00 : f32
    %341 = vector.broadcast %cst_74 : f32 to vector<8x96xf32>
    %342 = arith.addf %341, %340 : vector<8x96xf32>
    %343 = arith.divf %341, %342 : vector<8x96xf32>
    %344 = vector.extract_strided_slice %337 {offsets = [0, 96], sizes = [8, 32], strides = [1, 1]} : vector<8x128xf32> to vector<8x32xf32>
    %345 = math.tanh %344 : vector<8x32xf32>
    %346 = vector.extract_strided_slice %343 {offsets = [0, 0], sizes = [8, 32], strides = [1, 1]} : vector<8x96xf32> to vector<8x32xf32>
    %347 = vector.extract_strided_slice %343 {offsets = [0, 32], sizes = [8, 32], strides = [1, 1]} : vector<8x96xf32> to vector<8x32xf32>
    %348 = vector.extract_strided_slice %343 {offsets = [0, 64], sizes = [8, 32], strides = [1, 1]} : vector<8x96xf32> to vector<8x32xf32>
    %349 = arith.mulf %347, %330 : vector<8x32xf32>
    %350 = arith.mulf %346, %345 : vector<8x32xf32>
    %351 = arith.addf %349, %350 : vector<8x32xf32>
    %352 = math.tanh %351 : vector<8x32xf32>
    %353 = arith.mulf %348, %352 : vector<8x32xf32>
    %c56_75 = arith.constant 56 : index
    %c0_76 = arith.constant 0 : index
    %354 = vector.load %arg13[%c56_75, %c0_76] : memref<64x32xf32, #tpu.memory_space<vmem>>, vector<8x32xf32>
    tpu.vector_store %arg13[%c56_75, %c0_76], %353 {strides = array<i32>} : memref<64x32xf32, #tpu.memory_space<vmem>>, vector<8x32xf32>,
    %c0_77 = arith.constant 0 : index
    %c0_78 = arith.constant 0 : index
    %355 = vector.load %arg13[%c0_77, %c0_78] : memref<64x32xf32, #tpu.memory_space<vmem>>, vector<64x32xf32>
    %356 = arith.truncf %355 : vector<64x32xf32> to vector<64x32xbf16>
    %c0_79 = arith.constant 0 : index
    %c0_80 = arith.constant 0 : index
    %357 = vector.load %arg7[%c0_79, %c0_80] : memref<32x128xbf16, #tpu.memory_space<vmem>>, vector<32x128xbf16>
    %cst_81 = arith.constant dense<0.000000e+00> : vector<64x128xf32>
    %358 = tpu.matmul %356, %357, %cst_81 {dimension_numbers = #tpu.dot_dimension_numbers<[1], [0], [0], [1], [0, 0, 1, 1], [], []>} : vector<64x32xbf16>, vector<32x128xbf16>, vector<64x128xf32> -> vector<64x128xf32>
    %c0_82 = arith.constant 0 : index
    %c0_83 = arith.constant 0 : index
    %359 = vector.load %arg9[%c0_82, %c0_83] : memref<1x128xf32, #tpu.memory_space<vmem>>, vector<1x128xf32>
    %360 = vector.broadcast %359 : vector<1x128xf32> to vector<64x128xf32>
    %361 = arith.addf %358, %360 : vector<64x128xf32>
    %c0_84 = arith.constant 0 : index
    %c0_85 = arith.constant 0 : index
    %362 = vector.load %arg8[%c0_84, %c0_85] : memref<32x128xbf16, #tpu.memory_space<vmem>>, vector<32x128xbf16>
    %cst_86 = arith.constant 0.000000e+00 : f32
    %363 = vector.broadcast %cst_86 : f32 to vector<8x32xf32>
    %cst_87 = arith.constant 0.000000e+00 : f32
    %364 = vector.broadcast %cst_87 : f32 to vector<8x32xf32>
    %365 = vector.extract_strided_slice %361 {offsets = [0, 0], sizes = [8, 128], strides = [1, 1]} : vector<64x128xf32> to vector<8x128xf32>
    %366 = arith.truncf %363 : vector<8x32xf32> to vector<8x32xbf16>
    %cst_88 = arith.constant dense<0.000000e+00> : vector<8x128xf32>
    %367 = tpu.matmul %366, %362, %cst_88 {dimension_numbers = #tpu.dot_dimension_numbers<[1], [0], [0], [1], [0, 0, 1, 1], [], []>} : vector<8x32xbf16>, vector<32x128xbf16>, vector<8x128xf32> -> vector<8x128xf32>
    %368 = arith.addf %365, %367 : vector<8x128xf32>
    %369 = vector.extract_strided_slice %368 {offsets = [0, 0], sizes = [8, 96], strides = [1, 1]} : vector<8x128xf32> to vector<8x96xf32>
    %370 = arith.negf %369 : vector<8x96xf32>
    %371 = math.exp %370 : vector<8x96xf32>
    %cst_89 = arith.constant 1.000000e+00 : f32
    %372 = vector.broadcast %cst_89 : f32 to vector<8x96xf32>
    %373 = arith.addf %372, %371 : vector<8x96xf32>
    %374 = arith.divf %372, %373 : vector<8x96xf32>
    %375 = vector.extract_strided_slice %368 {offsets = [0, 96], sizes = [8, 32], strides = [1, 1]} : vector<8x128xf32> to vector<8x32xf32>
    %376 = math.tanh %375 : vector<8x32xf32>
    %377 = vector.extract_strided_slice %374 {offsets = [0, 0], sizes = [8, 32], strides = [1, 1]} : vector<8x96xf32> to vector<8x32xf32>
    %378 = vector.extract_strided_slice %374 {offsets = [0, 32], sizes = [8, 32], strides = [1, 1]} : vector<8x96xf32> to vector<8x32xf32>
    %379 = vector.extract_strided_slice %374 {offsets = [0, 64], sizes = [8, 32], strides = [1, 1]} : vector<8x96xf32> to vector<8x32xf32>
    %380 = arith.mulf %378, %364 : vector<8x32xf32>
    %381 = arith.mulf %377, %376 : vector<8x32xf32>
    %382 = arith.addf %380, %381 : vector<8x32xf32>
    %383 = math.tanh %382 : vector<8x32xf32>
    %384 = arith.mulf %379, %383 : vector<8x32xf32>
    %385 = vector.extract_strided_slice %361 {offsets = [8, 0], sizes = [8, 128], strides = [1, 1]} : vector<64x128xf32> to vector<8x128xf32>
    %386 = arith.truncf %384 : vector<8x32xf32> to vector<8x32xbf16>
    %cst_90 = arith.constant dense<0.000000e+00> : vector<8x128xf32>
    %387 = tpu.matmul %386, %362, %cst_90 {dimension_numbers = #tpu.dot_dimension_numbers<[1], [0], [0], [1], [0, 0, 1, 1], [], []>} : vector<8x32xbf16>, vector<32x128xbf16>, vector<8x128xf32> -> vector<8x128xf32>
    %388 = arith.addf %385, %387 : vector<8x128xf32>
    %389 = vector.extract_strided_slice %388 {offsets = [0, 0], sizes = [8, 96], strides = [1, 1]} : vector<8x128xf32> to vector<8x96xf32>
    %390 = arith.negf %389 : vector<8x96xf32>
    %391 = math.exp %390 : vector<8x96xf32>
    %cst_91 = arith.constant 1.000000e+00 : f32
    %392 = vector.broadcast %cst_91 : f32 to vector<8x96xf32>
    %393 = arith.addf %392, %391 : vector<8x96xf32>
    %394 = arith.divf %392, %393 : vector<8x96xf32>
    %395 = vector.extract_strided_slice %388 {offsets = [0, 96], sizes = [8, 32], strides = [1, 1]} : vector<8x128xf32> to vector<8x32xf32>
    %396 = math.tanh %395 : vector<8x32xf32>
    %397 = vector.extract_strided_slice %394 {offsets = [0, 0], sizes = [8, 32], strides = [1, 1]} : vector<8x96xf32> to vector<8x32xf32>
    %398 = vector.extract_strided_slice %394 {offsets = [0, 32], sizes = [8, 32], strides = [1, 1]} : vector<8x96xf32> to vector<8x32xf32>
    %399 = vector.extract_strided_slice %394 {offsets = [0, 64], sizes = [8, 32], strides = [1, 1]} : vector<8x96xf32> to vector<8x32xf32>
    %400 = arith.mulf %398, %382 : vector<8x32xf32>
    %401 = arith.mulf %397, %396 : vector<8x32xf32>
    %402 = arith.addf %400, %401 : vector<8x32xf32>
    %403 = math.tanh %402 : vector<8x32xf32>
    %404 = arith.mulf %399, %403 : vector<8x32xf32>
    %405 = vector.extract_strided_slice %361 {offsets = [16, 0], sizes = [8, 128], strides = [1, 1]} : vector<64x128xf32> to vector<8x128xf32>
    %406 = arith.truncf %404 : vector<8x32xf32> to vector<8x32xbf16>
    %cst_92 = arith.constant dense<0.000000e+00> : vector<8x128xf32>
    %407 = tpu.matmul %406, %362, %cst_92 {dimension_numbers = #tpu.dot_dimension_numbers<[1], [0], [0], [1], [0, 0, 1, 1], [], []>} : vector<8x32xbf16>, vector<32x128xbf16>, vector<8x128xf32> -> vector<8x128xf32>
    %408 = arith.addf %405, %407 : vector<8x128xf32>
    %409 = vector.extract_strided_slice %408 {offsets = [0, 0], sizes = [8, 96], strides = [1, 1]} : vector<8x128xf32> to vector<8x96xf32>
    %410 = arith.negf %409 : vector<8x96xf32>
    %411 = math.exp %410 : vector<8x96xf32>
    %cst_93 = arith.constant 1.000000e+00 : f32
    %412 = vector.broadcast %cst_93 : f32 to vector<8x96xf32>
    %413 = arith.addf %412, %411 : vector<8x96xf32>
    %414 = arith.divf %412, %413 : vector<8x96xf32>
    %415 = vector.extract_strided_slice %408 {offsets = [0, 96], sizes = [8, 32], strides = [1, 1]} : vector<8x128xf32> to vector<8x32xf32>
    %416 = math.tanh %415 : vector<8x32xf32>
    %417 = vector.extract_strided_slice %414 {offsets = [0, 0], sizes = [8, 32], strides = [1, 1]} : vector<8x96xf32> to vector<8x32xf32>
    %418 = vector.extract_strided_slice %414 {offsets = [0, 32], sizes = [8, 32], strides = [1, 1]} : vector<8x96xf32> to vector<8x32xf32>
    %419 = vector.extract_strided_slice %414 {offsets = [0, 64], sizes = [8, 32], strides = [1, 1]} : vector<8x96xf32> to vector<8x32xf32>
    %420 = arith.mulf %418, %402 : vector<8x32xf32>
    %421 = arith.mulf %417, %416 : vector<8x32xf32>
    %422 = arith.addf %420, %421 : vector<8x32xf32>
    %423 = math.tanh %422 : vector<8x32xf32>
    %424 = arith.mulf %419, %423 : vector<8x32xf32>
    %425 = vector.extract_strided_slice %361 {offsets = [24, 0], sizes = [8, 128], strides = [1, 1]} : vector<64x128xf32> to vector<8x128xf32>
    %426 = arith.truncf %424 : vector<8x32xf32> to vector<8x32xbf16>
    %cst_94 = arith.constant dense<0.000000e+00> : vector<8x128xf32>
    %427 = tpu.matmul %426, %362, %cst_94 {dimension_numbers = #tpu.dot_dimension_numbers<[1], [0], [0], [1], [0, 0, 1, 1], [], []>} : vector<8x32xbf16>, vector<32x128xbf16>, vector<8x128xf32> -> vector<8x128xf32>
    %428 = arith.addf %425, %427 : vector<8x128xf32>
    %429 = vector.extract_strided_slice %428 {offsets = [0, 0], sizes = [8, 96], strides = [1, 1]} : vector<8x128xf32> to vector<8x96xf32>
    %430 = arith.negf %429 : vector<8x96xf32>
    %431 = math.exp %430 : vector<8x96xf32>
    %cst_95 = arith.constant 1.000000e+00 : f32
    %432 = vector.broadcast %cst_95 : f32 to vector<8x96xf32>
    %433 = arith.addf %432, %431 : vector<8x96xf32>
    %434 = arith.divf %432, %433 : vector<8x96xf32>
    %435 = vector.extract_strided_slice %428 {offsets = [0, 96], sizes = [8, 32], strides = [1, 1]} : vector<8x128xf32> to vector<8x32xf32>
    %436 = math.tanh %435 : vector<8x32xf32>
    %437 = vector.extract_strided_slice %434 {offsets = [0, 0], sizes = [8, 32], strides = [1, 1]} : vector<8x96xf32> to vector<8x32xf32>
    %438 = vector.extract_strided_slice %434 {offsets = [0, 32], sizes = [8, 32], strides = [1, 1]} : vector<8x96xf32> to vector<8x32xf32>
    %439 = vector.extract_strided_slice %434 {offsets = [0, 64], sizes = [8, 32], strides = [1, 1]} : vector<8x96xf32> to vector<8x32xf32>
    %440 = arith.mulf %438, %422 : vector<8x32xf32>
    %441 = arith.mulf %437, %436 : vector<8x32xf32>
    %442 = arith.addf %440, %441 : vector<8x32xf32>
    %443 = math.tanh %442 : vector<8x32xf32>
    %444 = arith.mulf %439, %443 : vector<8x32xf32>
    %445 = vector.extract_strided_slice %361 {offsets = [32, 0], sizes = [8, 128], strides = [1, 1]} : vector<64x128xf32> to vector<8x128xf32>
    %446 = arith.truncf %444 : vector<8x32xf32> to vector<8x32xbf16>
    %cst_96 = arith.constant dense<0.000000e+00> : vector<8x128xf32>
    %447 = tpu.matmul %446, %362, %cst_96 {dimension_numbers = #tpu.dot_dimension_numbers<[1], [0], [0], [1], [0, 0, 1, 1], [], []>} : vector<8x32xbf16>, vector<32x128xbf16>, vector<8x128xf32> -> vector<8x128xf32>
    %448 = arith.addf %445, %447 : vector<8x128xf32>
    %449 = vector.extract_strided_slice %448 {offsets = [0, 0], sizes = [8, 96], strides = [1, 1]} : vector<8x128xf32> to vector<8x96xf32>
    %450 = arith.negf %449 : vector<8x96xf32>
    %451 = math.exp %450 : vector<8x96xf32>
    %cst_97 = arith.constant 1.000000e+00 : f32
    %452 = vector.broadcast %cst_97 : f32 to vector<8x96xf32>
    %453 = arith.addf %452, %451 : vector<8x96xf32>
    %454 = arith.divf %452, %453 : vector<8x96xf32>
    %455 = vector.extract_strided_slice %448 {offsets = [0, 96], sizes = [8, 32], strides = [1, 1]} : vector<8x128xf32> to vector<8x32xf32>
    %456 = math.tanh %455 : vector<8x32xf32>
    %457 = vector.extract_strided_slice %454 {offsets = [0, 0], sizes = [8, 32], strides = [1, 1]} : vector<8x96xf32> to vector<8x32xf32>
    %458 = vector.extract_strided_slice %454 {offsets = [0, 32], sizes = [8, 32], strides = [1, 1]} : vector<8x96xf32> to vector<8x32xf32>
    %459 = vector.extract_strided_slice %454 {offsets = [0, 64], sizes = [8, 32], strides = [1, 1]} : vector<8x96xf32> to vector<8x32xf32>
    %460 = arith.mulf %458, %442 : vector<8x32xf32>
    %461 = arith.mulf %457, %456 : vector<8x32xf32>
    %462 = arith.addf %460, %461 : vector<8x32xf32>
    %463 = math.tanh %462 : vector<8x32xf32>
    %464 = arith.mulf %459, %463 : vector<8x32xf32>
    %465 = vector.extract_strided_slice %361 {offsets = [40, 0], sizes = [8, 128], strides = [1, 1]} : vector<64x128xf32> to vector<8x128xf32>
    %466 = arith.truncf %464 : vector<8x32xf32> to vector<8x32xbf16>
    %cst_98 = arith.constant dense<0.000000e+00> : vector<8x128xf32>
    %467 = tpu.matmul %466, %362, %cst_98 {dimension_numbers = #tpu.dot_dimension_numbers<[1], [0], [0], [1], [0, 0, 1, 1], [], []>} : vector<8x32xbf16>, vector<32x128xbf16>, vector<8x128xf32> -> vector<8x128xf32>
    %468 = arith.addf %465, %467 : vector<8x128xf32>
    %469 = vector.extract_strided_slice %468 {offsets = [0, 0], sizes = [8, 96], strides = [1, 1]} : vector<8x128xf32> to vector<8x96xf32>
    %470 = arith.negf %469 : vector<8x96xf32>
    %471 = math.exp %470 : vector<8x96xf32>
    %cst_99 = arith.constant 1.000000e+00 : f32
    %472 = vector.broadcast %cst_99 : f32 to vector<8x96xf32>
    %473 = arith.addf %472, %471 : vector<8x96xf32>
    %474 = arith.divf %472, %473 : vector<8x96xf32>
    %475 = vector.extract_strided_slice %468 {offsets = [0, 96], sizes = [8, 32], strides = [1, 1]} : vector<8x128xf32> to vector<8x32xf32>
    %476 = math.tanh %475 : vector<8x32xf32>
    %477 = vector.extract_strided_slice %474 {offsets = [0, 0], sizes = [8, 32], strides = [1, 1]} : vector<8x96xf32> to vector<8x32xf32>
    %478 = vector.extract_strided_slice %474 {offsets = [0, 32], sizes = [8, 32], strides = [1, 1]} : vector<8x96xf32> to vector<8x32xf32>
    %479 = vector.extract_strided_slice %474 {offsets = [0, 64], sizes = [8, 32], strides = [1, 1]} : vector<8x96xf32> to vector<8x32xf32>
    %480 = arith.mulf %478, %462 : vector<8x32xf32>
    %481 = arith.mulf %477, %476 : vector<8x32xf32>
    %482 = arith.addf %480, %481 : vector<8x32xf32>
    %483 = math.tanh %482 : vector<8x32xf32>
    %484 = arith.mulf %479, %483 : vector<8x32xf32>
    %485 = vector.extract_strided_slice %361 {offsets = [48, 0], sizes = [8, 128], strides = [1, 1]} : vector<64x128xf32> to vector<8x128xf32>
    %486 = arith.truncf %484 : vector<8x32xf32> to vector<8x32xbf16>
    %cst_100 = arith.constant dense<0.000000e+00> : vector<8x128xf32>
    %487 = tpu.matmul %486, %362, %cst_100 {dimension_numbers = #tpu.dot_dimension_numbers<[1], [0], [0], [1], [0, 0, 1, 1], [], []>} : vector<8x32xbf16>, vector<32x128xbf16>, vector<8x128xf32> -> vector<8x128xf32>
    %488 = arith.addf %485, %487 : vector<8x128xf32>
    %489 = vector.extract_strided_slice %488 {offsets = [0, 0], sizes = [8, 96], strides = [1, 1]} : vector<8x128xf32> to vector<8x96xf32>
    %490 = arith.negf %489 : vector<8x96xf32>
    %491 = math.exp %490 : vector<8x96xf32>
    %cst_101 = arith.constant 1.000000e+00 : f32
    %492 = vector.broadcast %cst_101 : f32 to vector<8x96xf32>
    %493 = arith.addf %492, %491 : vector<8x96xf32>
    %494 = arith.divf %492, %493 : vector<8x96xf32>
    %495 = vector.extract_strided_slice %488 {offsets = [0, 96], sizes = [8, 32], strides = [1, 1]} : vector<8x128xf32> to vector<8x32xf32>
    %496 = math.tanh %495 : vector<8x32xf32>
    %497 = vector.extract_strided_slice %494 {offsets = [0, 0], sizes = [8, 32], strides = [1, 1]} : vector<8x96xf32> to vector<8x32xf32>
    %498 = vector.extract_strided_slice %494 {offsets = [0, 32], sizes = [8, 32], strides = [1, 1]} : vector<8x96xf32> to vector<8x32xf32>
    %499 = vector.extract_strided_slice %494 {offsets = [0, 64], sizes = [8, 32], strides = [1, 1]} : vector<8x96xf32> to vector<8x32xf32>
    %500 = arith.mulf %498, %482 : vector<8x32xf32>
    %501 = arith.mulf %497, %496 : vector<8x32xf32>
    %502 = arith.addf %500, %501 : vector<8x32xf32>
    %503 = math.tanh %502 : vector<8x32xf32>
    %504 = arith.mulf %499, %503 : vector<8x32xf32>
    %505 = vector.extract_strided_slice %361 {offsets = [56, 0], sizes = [8, 128], strides = [1, 1]} : vector<64x128xf32> to vector<8x128xf32>
    %506 = arith.truncf %504 : vector<8x32xf32> to vector<8x32xbf16>
    %cst_102 = arith.constant dense<0.000000e+00> : vector<8x128xf32>
    %507 = tpu.matmul %506, %362, %cst_102 {dimension_numbers = #tpu.dot_dimension_numbers<[1], [0], [0], [1], [0, 0, 1, 1], [], []>} : vector<8x32xbf16>, vector<32x128xbf16>, vector<8x128xf32> -> vector<8x128xf32>
    %508 = arith.addf %505, %507 : vector<8x128xf32>
    %509 = vector.extract_strided_slice %508 {offsets = [0, 0], sizes = [8, 96], strides = [1, 1]} : vector<8x128xf32> to vector<8x96xf32>
    %510 = arith.negf %509 : vector<8x96xf32>
    %511 = math.exp %510 : vector<8x96xf32>
    %cst_103 = arith.constant 1.000000e+00 : f32
    %512 = vector.broadcast %cst_103 : f32 to vector<8x96xf32>
    %513 = arith.addf %512, %511 : vector<8x96xf32>
    %514 = arith.divf %512, %513 : vector<8x96xf32>
    %515 = vector.extract_strided_slice %508 {offsets = [0, 96], sizes = [8, 32], strides = [1, 1]} : vector<8x128xf32> to vector<8x32xf32>
    %516 = math.tanh %515 : vector<8x32xf32>
    %517 = vector.extract_strided_slice %514 {offsets = [0, 0], sizes = [8, 32], strides = [1, 1]} : vector<8x96xf32> to vector<8x32xf32>
    %518 = vector.extract_strided_slice %514 {offsets = [0, 32], sizes = [8, 32], strides = [1, 1]} : vector<8x96xf32> to vector<8x32xf32>
    %519 = vector.extract_strided_slice %514 {offsets = [0, 64], sizes = [8, 32], strides = [1, 1]} : vector<8x96xf32> to vector<8x32xf32>
    %520 = arith.mulf %518, %502 : vector<8x32xf32>
    %521 = arith.mulf %517, %516 : vector<8x32xf32>
    %522 = arith.addf %520, %521 : vector<8x32xf32>
    %523 = math.tanh %522 : vector<8x32xf32>
    %524 = arith.mulf %519, %523 : vector<8x32xf32>
    %525 = arith.truncf %524 : vector<8x32xf32> to vector<8x32xbf16>
    %c0_104 = arith.constant 0 : index
    %c0_105 = arith.constant 0 : index
    %526 = vector.load %arg10[%c0_104, %c0_105] : memref<32x16xbf16, #tpu.memory_space<vmem>>, vector<32x16xbf16>
    %cst_106 = arith.constant dense<0.000000e+00> : vector<8x16xf32>
    %527 = tpu.matmul %525, %526, %cst_106 {dimension_numbers = #tpu.dot_dimension_numbers<[1], [0], [0], [1], [0, 0, 1, 1], [], []>} : vector<8x32xbf16>, vector<32x16xbf16>, vector<8x16xf32> -> vector<8x16xf32>
    %c0_107 = arith.constant 0 : index
    %c0_108 = arith.constant 0 : index
    %528 = vector.load %arg11[%c0_107, %c0_108] : memref<1x16xf32, #tpu.memory_space<vmem>>, vector<1x16xf32>
    %529 = vector.broadcast %528 : vector<1x16xf32> to vector<8x16xf32>
    %530 = arith.addf %527, %529 : vector<8x16xf32>
    %531 = arith.mulf %530, %530 : vector<8x16xf32>
    %cst_109 = arith.constant dense<0.000000e+00> : vector<8xf32>
    %532 = vector.multi_reduction <add>, %531, %cst_109 [1] : vector<8x16xf32> to vector<8xf32>
    %533 = vector.shape_cast %532 : vector<8xf32> to vector<8x1xf32>
    %cst_110 = arith.constant 9.99999996E-13 : f32
    %534 = vector.broadcast %cst_110 : f32 to vector<8x1xf32>
    %535 = arith.addf %533, %534 : vector<8x1xf32>
    %536 = math.rsqrt %535 : vector<8x1xf32>
    %537 = vector.broadcast %536 : vector<8x1xf32> to vector<8x16xf32>
    %538 = arith.mulf %530, %537 : vector<8x16xf32>
    %c0_111 = arith.constant 0 : index
    %c0_112 = arith.constant 0 : index
    %539 = vector.load %arg12[%c0_111, %c0_112] : memref<8x16xf32, #tpu.memory_space<vmem>>, vector<8x16xf32>
    tpu.vector_store %arg12[%c0_111, %c0_112], %538 {strides = array<i32>} : memref<8x16xf32, #tpu.memory_space<vmem>>, vector<8x16xf32>,
    return
  }
}

</mosaic_0001>

<bundles_post_ra>
// kernel: lstm_embedder_forward.1
= control target key start
LH: loop header
LB: loop body
LE: loop exit
PB: predicated region body
PF: predicated region fallthrough
CT: control target
= control target key end

     0   :  { %vm91_vm0 = vcmask 1043456   ;;  %vm78_vm1 = vcmask 64512   ;;  %v2926_v1 = vmov 0.0   ;;  %vm2927_vm2 = vmmov 0   ;;  %s2929_s13 = smov 32   ;;  %s3547_s1 = inlined_call_operand.vmem [shape: bf16[8,128], index: 1, kind: input, shape index: {}]   ;;  %s3548_s2 = inlined_call_operand.vmem [shape: bf16[32,128], index: 2, kind: input, shape index: {}]   ;;  %s3549_s0 = inlined_call_operand.vmem [shape: bf16[64,8], index: 0, kind: input, shape index: {}]   ;;  %s3550_s3 = inlined_call_operand.vmem [shape: f32[1,128], index: 3, kind: input, shape index: {}]   ;;  %s3551_s4 = inlined_call_operand.vmem [shape: bf16[32,128], index: 4, kind: input, shape index: {}]   ;;  %s3552_s5 = inlined_call_operand.vmem [shape: bf16[32,128], index: 5, kind: input, shape index: {}]   ;;  %s3553_s6 = inlined_call_operand.vmem [shape: f32[1,128], index: 6, kind: input, shape index: {}]   ;;  %s3554_s7 = inlined_call_operand.vmem [shape: bf16[32,128], index: 7, kind: input, shape index: {}]   ;;  %s3555_s8 = inlined_call_operand.vmem [shape: bf16[32,128], index: 8, kind: input, shape index: {}]   ;;  %s3556_s9 = inlined_call_operand.vmem [shape: f32[1,128], index: 9, kind: input, shape index: {}]   ;;  %s3557_s10 = inlined_call_operand.vmem [shape: bf16[32,16], index: 10, kind: input, shape index: {}]   ;;  %s3558_s11 = inlined_call_operand.vmem [shape: f32[1,16], index: 11, kind: input, shape index: {}]   ;;  %s3559_s12 = inlined_call_operand.vmem [shape: f32[8,16], index: 12, kind: output, shape index: {}]  }
   0x1   :  { %v50_v0 = vld [vmem:[%s3547_s1] sm:$0xf]  ;;  %2486 = vmatprep.subr.bf16.mxu1 %v2926_v1  ;;  %2490 = vmatprep.mubr.msk.bf16.mxu1 %vm2927_vm2, %v2926_v1  ;;  %v3005_v3 = vld [vmem:[%s3548_s2 + $0x8] sm:$0xff]   ;;  %v2928_v7 = vmov 0   ;;  %vm176_vm3 = vcmask 261120   ;;  %v2720_v50 = vld [vmem:[%s3549_s0 + $0x10] sm:$0xff]  }
   0x2   :  { %2710 = vmatprep.subr.msk.bf16.mxu0 %vm91_vm0, %v50_v0  ;;  %v93_v2 = vsel %vm91_vm0, %v50_v0, 0  ;;  %v2717_v4 = vld [vmem:[%s3549_s0] sm:$0xff]   ;;  %2487 = vmatpush3.bf16.msra.mxu1 %v3005_v3  ;;  %v2718_v5 = vld [vmem:[%s3549_s0 + $0x8] sm:$0xff]   ;;  %v2721_v51 = vld [vmem:[%s3549_s0 + $0x18] sm:$0xff]   ;;  %vm2294_vm4 = vcmask 130048  }
   0x3   :  { %2477 = vmatpush3.bf16.msra.mxu0 %v93_v2  ;;  %2478 = vmatprep.mubr.msk.bf16.mxu0 %vm78_vm1, %v2717_v4  ;;  %v3020_v6 = vld [vmem:[%s3548_s2] sm:$0xff]  }
   0x4   :  { %2502 = vmatprep.subr.bf16.mxu0 %v2926_v1  ;;  %2488 = vmatprep.subr.bf16.mxu1 %v2926_v1  ;;  %v3041_v9 = vld [vmem:[%s3550_s3] ss:$0 sm:$0xff]  ;;  %s2930_s3 = smov 64  }
   0x6   :  { %2479 = vmatmul.mubr.msk.bf16.vlgmr.msra.gmra.mxu0 %vm78_vm1, %v2718_v5  ;;  %2489 = vmatpush3.bf16.msra.mxu1 %v3020_v6 }
   0x7   :  { %2503 = vmatpush3.bf16.msra.mxu0 %v3005_v3  ;;  %2494 = vmatprep.subr.bf16.mxu1 %v2926_v1 }
   0x8   :  { %2504 = vmatprep.subr.bf16.mxu0 %v2926_v1  ;;  %2482 = vmatprep.mubr.msk.bf16.mxu0 %vm78_vm1, %v2720_v50 }
   0x9   :  { %2491 = vmatmul.mubr.bf16.vlgmr.msra.gmra.mxu1 %v2928_v7 }
   0xa   :  { %2495 = vmatpush3.bf16.msra.mxu1 %v3005_v3  ;;  %2498 = vmatprep.mubr.msk.bf16.mxu1 %vm2927_vm2, %v2926_v1 }
   0xb   :  { %2505 = vmatpush3.bf16.msra.mxu0 %v3020_v6  ;;  %2496 = vmatprep.subr.bf16.mxu1 %v2926_v1 }
   0xc   :  { %2518 = vmatprep.subr.bf16.mxu0 %v2926_v1 }
   0xe   :  { %2497 = vmatpush3.bf16.msra.mxu1 %v3020_v6  ;;  %2483 = vmatmul.mubr.msk.bf16.gmra.mxu0 %vm78_vm1, %v2721_v51 }
   0xf   :  { %2510 = vmatprep.subr.bf16.mxu1 %v2926_v1  ;;  %2506 = vmatprep.mubr.msk.bf16.mxu0 %vm2927_vm2, %v2926_v1 }
  0xc6   :  { %v3036_v8 = vpop.f32.mrf.mxu0 }
  0xc7   :  { %v138_v61 = vadd.f32 %v3036_v8, %v3041_v9 }
  0xc8   :  { %v129_v10 = vpop.f32.mrf.mxu0 }
  0xc9   :  { %v130_v11 = vadd.f32 %v3041_v9, %v129_v10  ;;  %v214_v12 = vpop.f32.mrf.mxu1 }
  0xca   :  { %v3059_v32 = vpop.f32.mrf.mxu0 }
  0xcb   :  { %v220_v13 = vadd.f32 %v214_v12, %v130_v11  ;;  %v2492_v14 = vpop.f32.mrf.mxu1 }
  0xcc   :  { %v132_v33 = vpop.f32.mrf.mxu0 }
  0xcd   :  { %2732 = vtanh.f32 %v220_v13  ;;  %v217_v15 = vpop.f32.mrf.mxu1  ;;  %v2317_v18 = vmul.f32 -1.442695, %v220_v13  ;;  %v133_v34 = vadd.f32 %v3041_v9, %v132_v33 }
  0xce   :  { %v3087_v57 = vpop.f32.mrf.mxu0 }
  0xcf   :  { %v2493_v16 = vpop.f32.mrf.mxu1  ;;  %2734 = vpow2.f32 %v2317_v18 }
  0xd0   :  { %v3089_v58 = vpop.f32.mrf.mxu0 }
  0xd2   :  { %v3091_v59 = vpop.f32.mrf.mxu0 }
  0xd4   :  { %v3093_v60 = vpop.f32.mrf.mxu0 }
  0xda   :  { %v2733_v17 = vpop.eup %2732 }
  0xdb   :  { %230 = vrot.lane.b32.xlu0 %v2733_v17, %s2929_s13 }
  0xdc   :  { %v2735_v19 = vpop.eup %2734 }
  0xdd   :  { %v224_v20 = vadd.f32 1.0, %v2735_v19 }
  0xdf   :  { %2736 = vrcp.f32 %v224_v20 }
  0xec   :  { %v2737_v21 = vpop.eup %2736 }
  0xed   :  { %v228_v24 = vmul.f32 0.0, %v2737_v21 }
 0x14d   :  { %v231_v22 = vpop.permute.xlu0 %230 }
 0x14e   :  { %v233_v23 = vmul.f32 %v2737_v21, %v231_v22 }
 0x150   :  { %235 = vrot.lane.b32.xlu0 %v233_v23, %s2929_s13  ;;  %v141_v23 = vadd.f32 %v3059_v32, %v3041_v9 }
 0x1c2   :  { %v236_v25 = vpop.permute.xlu0 %235 }
 0x1c3   :  { %v238_v26 = vadd.f32 %v236_v25, %v228_v24 }
 0x1c5   :  { %2738 = vtanh.f32 %v238_v26 }
 0x1d2   :  { %v2739_v27 = vpop.eup %2738 }
 0x1d3   :  { %241 = vrot.lane.b32.xlu1 %v2739_v27, %s2929_s13 }
 0x245   :  { %v242_v28 = vpop.permute.xlu1 %241 }
 0x246   :  { %v3047_v29 = vmul.f32 %v2737_v21, %v242_v28 }
 0x248   :  { %v250_v30 = vpack.c.bf16 %v3047_v29, %v3047_v29 }
 0x24a   :  { %252 = vrot.lane.b32.xlu1 %v250_v30, %s2930_s3 }
 0x2bc   :  { %v253_v31 = vpop.permute.xlu1 %252 }
 0x2bd   :  { %2499 = vmatmul.mubr.msk.bf16.vlgmr.msra.gmra.mxu1 %vm176_vm3, %v253_v31 }
 0x2be   :  { %2511 = vmatpush3.bf16.msra.mxu1 %v3005_v3  ;;  %2514 = vmatprep.mubr.msk.bf16.mxu1 %vm2927_vm2, %v2926_v1 }
 0x2bf   :  { %2512 = vmatprep.subr.bf16.mxu1 %v2926_v1 }
 0x2c2   :  { %2513 = vmatpush3.bf16.msra.mxu1 %v3020_v6 }
 0x2c3   :  { %2526 = vmatprep.subr.bf16.mxu1 %v2926_v1 }
 0x37d   :  { %v291_v35 = vpop.f32.mrf.mxu1 }
 0x37e   :  { %v297_v36 = vadd.f32 %v291_v35, %v133_v34 }
 0x37f   :  { %v2500_v37 = vpop.f32.mrf.mxu1 }
 0x380   :  { %2740 = vtanh.f32 %v297_v36  ;;  %v2319_v41 = vmul.f32 -1.442695, %v297_v36 }
 0x381   :  { %v294_v38 = vpop.f32.mrf.mxu1 }
 0x382   :  { %2742 = vpow2.f32 %v2319_v41 }
 0x383   :  { %v2501_v39 = vpop.f32.mrf.mxu1 }
 0x38d   :  { %v2741_v40 = vpop.eup %2740 }
 0x38e   :  { %307 = vrot.lane.b32.xlu0 %v2741_v40, %s2929_s13 }
 0x38f   :  { %v2743_v42 = vpop.eup %2742 }
 0x390   :  { %v301_v43 = vadd.f32 1.0, %v2743_v42 }
 0x392   :  { %2744 = vrcp.f32 %v301_v43 }
 0x39f   :  { %v2745_v44 = vpop.eup %2744 }
 0x3a0   :  { %v305_v47 = vmul.f32 %v2745_v44, %v238_v26 }
 0x400   :  { %v308_v45 = vpop.permute.xlu0 %307 }
 0x401   :  { %v310_v46 = vmul.f32 %v2745_v44, %v308_v45  ;;  %v146_v45 = vadd.f32 %v3041_v9, %v3089_v58 }
 0x403   :  { %312 = vrot.lane.b32.xlu1 %v310_v46, %s2929_s13 }
 0x475   :  { %v313_v48 = vpop.permute.xlu1 %312 }
 0x476   :  { %v315_v49 = vadd.f32 %v313_v48, %v305_v47 }
 0x478   :  { %2746 = vtanh.f32 %v315_v49 }
 0x485   :  { %v2747_v52 = vpop.eup %2746 }
 0x486   :  { %318 = vrot.lane.b32.xlu0 %v2747_v52, %s2929_s13 }
 0x4f8   :  { %v319_v53 = vpop.permute.xlu0 %318 }
 0x4f9   :  { %v3075_v54 = vmul.f32 %v2745_v44, %v319_v53 }
 0x4fb   :  { %v327_v55 = vpack.c.bf16 %v3075_v54, %v3075_v54 }
 0x4fd   :  { %329 = vrot.lane.b32.xlu1 %v327_v55, %s2930_s3 }
 0x56f   :  { %v330_v56 = vpop.permute.xlu1 %329 }
 0x570   :  { %2507 = vmatmul.mubr.msk.bf16.vlgmr.msra.gmra.mxu0 %vm176_vm3, %v330_v56 }
 0x571   :  { %2519 = vmatpush3.bf16.msra.mxu0 %v3005_v3  ;;  %2522 = vmatprep.mubr.msk.bf16.mxu0 %vm2927_vm2, %v2926_v1 }
 0x572   :  { %2520 = vmatprep.subr.bf16.mxu0 %v2926_v1 }
 0x575   :  { %2521 = vmatpush3.bf16.msra.mxu0 %v3020_v6 }
 0x576   :  { %2534 = vmatprep.subr.bf16.mxu0 %v2926_v1 }
 0x630   :  { %v368_v62 = vpop.f32.mrf.mxu0 }
 0x631   :  { %v374_v63 = vadd.f32 %v368_v62, %v138_v61 }
 0x632   :  { %v2508_v0 = vpop.f32.mrf.mxu0 }
 0x633   :  { %2748 = vtanh.f32 %v374_v63  ;;  %v2321_v10 = vmul.f32 -1.442695, %v374_v63 }
 0x634   :  { %v371_v2 = vpop.f32.mrf.mxu0 }
 0x635   :  { %2750 = vpow2.f32 %v2321_v10 }
 0x636   :  { %v2509_v4 = vpop.f32.mrf.mxu0 }
 0x640   :  { %v2749_v5 = vpop.eup %2748 }
 0x641   :  { %384 = vrot.lane.b32.xlu0 %v2749_v5, %s2929_s13 }
 0x642   :  { %v2751_v11 = vpop.eup %2750 }
 0x643   :  { %v378_v12 = vadd.f32 1.0, %v2751_v11 }
 0x645   :  { %2752 = vrcp.f32 %v378_v12  ;;  %v149_v12 = vadd.f32 %v3041_v9, %v3093_v60 }
 0x652   :  { %v2753_v13 = vpop.eup %2752 }
 0x653   :  { %v382_v8 = vmul.f32 %v2753_v13, %v315_v49 }
 0x6b3   :  { %v385_v14 = vpop.permute.xlu0 %384 }
 0x6b4   :  { %v387_v15 = vmul.f32 %v2753_v13, %v385_v14 }
 0x6b6   :  { %389 = vrot.lane.b32.xlu1 %v387_v15, %s2929_s13 }
 0x728   :  { %v390_v16 = vpop.permute.xlu1 %389 }
 0x729   :  { %v392_v17 = vadd.f32 %v390_v16, %v382_v8 }
 0x72b   :  { %2754 = vtanh.f32 %v392_v17 }
 0x738   :  { %v2755_v18 = vpop.eup %2754 }
 0x739   :  { %395 = vrot.lane.b32.xlu0 %v2755_v18, %s2929_s13 }
 0x7ab   :  { %v396_v19 = vpop.permute.xlu0 %395 }
 0x7ac   :  { %v3100_v20 = vmul.f32 %v2753_v13, %v396_v19 }
 0x7ae   :  { %v404_v21 = vpack.c.bf16 %v3100_v20, %v3100_v20 }
 0x7b0   :  { %406 = vrot.lane.b32.xlu1 %v404_v21, %s2930_s3 }
 0x822   :  { %v407_v22 = vpop.permute.xlu1 %406 }
 0x823   :  { %2515 = vmatmul.mubr.msk.bf16.vlgmr.msra.gmra.mxu1 %vm176_vm3, %v407_v22 }
 0x824   :  { %2527 = vmatpush3.bf16.msra.mxu1 %v3005_v3  ;;  %2530 = vmatprep.mubr.msk.bf16.mxu1 %vm2927_vm2, %v2926_v1 }
 0x825   :  { %2528 = vmatprep.subr.bf16.mxu1 %v2926_v1 }
 0x828   :  { %2529 = vmatpush3.bf16.msra.mxu1 %v3020_v6 }
 0x829   :  { %2542 = vmatprep.subr.bf16.mxu1 %v2926_v1 }
 0x8e3   :  { %v445_v24 = vpop.f32.mrf.mxu1 }
 0x8e4   :  { %v451_v25 = vadd.f32 %v445_v24, %v141_v23 }
 0x8e5   :  { %v2516_v26 = vpop.f32.mrf.mxu1 }
 0x8e6   :  { %2756 = vtanh.f32 %v451_v25  ;;  %v2323_v31 = vmul.f32 -1.442695, %v451_v25 }
 0x8e7   :  { %v448_v27 = vpop.f32.mrf.mxu1 }
 0x8e8   :  { %2758 = vpow2.f32 %v2323_v31  ;;  %v154_v31 = vadd.f32 %v3087_v57, %v3041_v9 }
 0x8e9   :  { %v2517_v28 = vpop.f32.mrf.mxu1 }
 0x8f3   :  { %v2757_v30 = vpop.eup %2756 }
 0x8f4   :  { %461 = vrot.lane.b32.xlu0 %v2757_v30, %s2929_s13 }
 0x8f5   :  { %v2759_v33 = vpop.eup %2758 }
 0x8f6   :  { %v455_v34 = vadd.f32 1.0, %v2759_v33 }
 0x8f8   :  { %2760 = vrcp.f32 %v455_v34 }
 0x905   :  { %v2761_v35 = vpop.eup %2760 }
 0x906   :  { %v459_v32 = vmul.f32 %v2761_v35, %v392_v17 }
 0x966   :  { %v462_v36 = vpop.permute.xlu0 %461 }
 0x967   :  { %v464_v37 = vmul.f32 %v2761_v35, %v462_v36 }
 0x969   :  { %466 = vrot.lane.b32.xlu1 %v464_v37, %s2929_s13 }
 0x9db   :  { %v467_v38 = vpop.permute.xlu1 %466 }
 0x9dc   :  { %v469_v39 = vadd.f32 %v467_v38, %v459_v32 }
 0x9de   :  { %2762 = vtanh.f32 %v469_v39 }
 0x9eb   :  { %v2763_v40 = vpop.eup %2762 }
 0x9ec   :  { %472 = vrot.lane.b32.xlu0 %v2763_v40, %s2929_s13 }
 0xa5e   :  { %v473_v41 = vpop.permute.xlu0 %472 }
 0xa5f   :  { %v3117_v42 = vmul.f32 %v2761_v35, %v473_v41 }
 0xa61   :  { %v481_v43 = vpack.c.bf16 %v3117_v42, %v3117_v42 }
 0xa63   :  { %483 = vrot.lane.b32.xlu1 %v481_v43, %s2930_s3 }
 0xad5   :  { %v484_v44 = vpop.permute.xlu1 %483 }
 0xad6   :  { %2523 = vmatmul.mubr.msk.bf16.vlgmr.msra.gmra.mxu0 %vm176_vm3, %v484_v44 }
 0xad7   :  { %2535 = vmatpush3.bf16.msra.mxu0 %v3005_v3  ;;  %2538 = vmatprep.mubr.msk.bf16.mxu0 %vm2927_vm2, %v2926_v1 }
 0xad8   :  { %2536 = vmatprep.subr.bf16.mxu0 %v2926_v1 }
 0xadb   :  { %2537 = vmatpush3.bf16.msra.mxu0 %v3020_v6 }
 0xb96   :  { %v522_v46 = vpop.f32.mrf.mxu0 }
 0xb97   :  { %v528_v47 = vadd.f32 %v522_v46, %v146_v45 }
 0xb98   :  { %v2524_v48 = vpop.f32.mrf.mxu0 }
 0xb99   :  { %2764 = vtanh.f32 %v528_v47  ;;  %v2325_v52 = vmul.f32 -1.442695, %v528_v47 }
 0xb9a   :  { %v525_v49 = vpop.f32.mrf.mxu0 }
 0xb9b   :  { %2766 = vpow2.f32 %v2325_v52  ;;  %v2722_v49 = vld [vmem:[%s3551_s4 + $0x8] sm:$0xff]  }
 0xb9c   :  { %v2525_v50 = vpop.f32.mrf.mxu0  ;;  %2550 = vmatprep.subr.bf16.mxu0 %v2722_v49 }
 0xba6   :  { %v2765_v51 = vpop.eup %2764 }
 0xba7   :  { %538 = vrot.lane.b32.xlu0 %v2765_v51, %s2929_s13 }
 0xba8   :  { %v2767_v53 = vpop.eup %2766 }
 0xba9   :  { %v532_v55 = vadd.f32 1.0, %v2767_v53 }
 0xbab   :  { %2768 = vrcp.f32 %v532_v55 }
 0xbb8   :  { %v2769_v56 = vpop.eup %2768 }
 0xbb9   :  { %v536_v58 = vmul.f32 %v2769_v56, %v469_v39 }
 0xc19   :  { %v539_v61 = vpop.permute.xlu0 %538 }
 0xc1a   :  { %v541_v62 = vmul.f32 %v2769_v56, %v539_v61 }
 0xc1c   :  { %543 = vrot.lane.b32.xlu1 %v541_v62, %s2929_s13 }
 0xc8e   :  { %v544_v63 = vpop.permute.xlu1 %543 }
 0xc8f   :  { %v546_v0 = vadd.f32 %v544_v63, %v536_v58  ;;  %v3192_v63 = vld [vmem:[%s3552_s5 + $0x8] sm:$0xff]  }
 0xc91   :  { %2770 = vtanh.f32 %v546_v0 }
 0xc9e   :  { %v2771_v2 = vpop.eup %2770 }
 0xc9f   :  { %549 = vrot.lane.b32.xlu0 %v2771_v2, %s2929_s13 }
 0xd11   :  { %v550_v4 = vpop.permute.xlu0 %549 }
 0xd12   :  { %v3133_v5 = vmul.f32 %v2769_v56, %v550_v4  ;;  %v157_v4 = vadd.f32 %v3091_v59, %v3041_v9 }
 0xd14   :  { %v558_v10 = vpack.c.bf16 %v3133_v5, %v3133_v5 }
 0xd16   :  { %560 = vrot.lane.b32.xlu1 %v558_v10, %s2930_s3 }
 0xd88   :  { %v561_v11 = vpop.permute.xlu1 %560 }
 0xd89   :  { %2531 = vmatmul.mubr.msk.bf16.vlgmr.msra.gmra.mxu1 %vm176_vm3, %v561_v11 }
 0xd8a   :  { %2543 = vmatpush3.bf16.msra.mxu1 %v3005_v3  ;;  %2546 = vmatprep.mubr.msk.bf16.mxu1 %vm2927_vm2, %v2926_v1 }
 0xd8b   :  { %2544 = vmatprep.subr.bf16.mxu1 %v2926_v1 }
 0xd8e   :  { %2545 = vmatpush3.bf16.msra.mxu1 %v3020_v6 }
 0xd8f   :  { %2562 = vmatprep.subr.bf16.mxu1 %v2926_v1 }
 0xe49   :  { %v599_v13 = vpop.f32.mrf.mxu1 }
 0xe4a   :  { %v605_v14 = vadd.f32 %v599_v13, %v149_v12 }
 0xe4b   :  { %v2532_v15 = vpop.f32.mrf.mxu1 }
 0xe4c   :  { %2772 = vtanh.f32 %v605_v14  ;;  %v2327_v3 = vmul.f32 -1.442695, %v605_v14 }
 0xe4d   :  { %v602_v8 = vpop.f32.mrf.mxu1 }
 0xe4e   :  { %2774 = vpow2.f32 %v2327_v3  ;;  %v3225_v8 = vld [vmem:[%s3553_s6] ss:$0 sm:$0xff] }
 0xe4f   :  { %v2533_v16 = vpop.f32.mrf.mxu1 }
 0xe59   :  { %v2773_v17 = vpop.eup %2772 }
 0xe5a   :  { %615 = vrot.lane.b32.xlu0 %v2773_v17, %s2929_s13 }
 0xe5b   :  { %v2775_v18 = vpop.eup %2774 }
 0xe5c   :  { %v609_v19 = vadd.f32 1.0, %v2775_v18 }
 0xe5e   :  { %2776 = vrcp.f32 %v609_v19 }
 0xe6b   :  { %v2777_v6 = vpop.eup %2776 }
 0xe6c   :  { %v613_v60 = vmul.f32 %v2777_v6, %v546_v0  ;;  %v3200_v0 = vld [vmem:[%s3552_s5] sm:$0xff]  }
 0xecc   :  { %v616_v21 = vpop.permute.xlu0 %615 }
 0xecd   :  { %v618_v22 = vmul.f32 %v2777_v6, %v616_v21 }
 0xecf   :  { %620 = vrot.lane.b32.xlu1 %v618_v22, %s2929_s13 }
 0xf41   :  { %v621_v23 = vpop.permute.xlu1 %620 }
 0xf42   :  { %v623_v24 = vadd.f32 %v621_v23, %v613_v60 }
 0xf44   :  { %2778 = vtanh.f32 %v623_v24 }
 0xf51   :  { %v2779_v25 = vpop.eup %2778 }
 0xf52   :  { %626 = vrot.lane.b32.xlu0 %v2779_v25, %s2929_s13 }
 0xfc4   :  { %v627_v26 = vpop.permute.xlu0 %626 }
 0xfc5   :  { %v3150_v27 = vmul.f32 %v2777_v6, %v627_v26 }
 0xfc7   :  { %v635_v28 = vpack.c.bf16 %v3150_v27, %v3150_v27 }
 0xfc9   :  { %637 = vrot.lane.b32.xlu1 %v635_v28, %s2930_s3 }
0x103b   :  { %v638_v30 = vpop.permute.xlu1 %637 }
0x103c   :  { %2539 = vmatmul.mubr.msk.bf16.vlgmr.msra.gmra.mxu0 %vm176_vm3, %v638_v30 }
0x103d   :  { %2551 = vmatpush3.bf16.msra.mxu0 %v2722_v49 }
0x10fc   :  { %v676_v33 = vpop.f32.mrf.mxu0 }
0x10fd   :  { %v682_v34 = vadd.f32 %v676_v33, %v154_v31 }
0x10fe   :  { %v2540_v35 = vpop.f32.mrf.mxu0 }
0x10ff   :  { %2780 = vtanh.f32 %v682_v34  ;;  %v2329_v38 = vmul.f32 -1.442695, %v682_v34 }
0x1100   :  { %v679_v36 = vpop.f32.mrf.mxu0 }
0x1101   :  { %2782 = vpow2.f32 %v2329_v38 }
0x1102   :  { %v2541_v37 = vpop.f32.mrf.mxu0 }
0x110c   :  { %v2781_v32 = vpop.eup %2780 }
0x110d   :  { %692 = vrot.lane.b32.xlu0 %v2781_v32, %s2929_s13 }
0x110e   :  { %v2783_v39 = vpop.eup %2782 }
0x110f   :  { %v686_v40 = vadd.f32 1.0, %v2783_v39 }
0x1111   :  { %2784 = vrcp.f32 %v686_v40 }
0x111e   :  { %v2785_v41 = vpop.eup %2784 }
0x111f   :  { %v690_v57 = vmul.f32 %v2785_v41, %v623_v24 }
0x117f   :  { %v693_v43 = vpop.permute.xlu0 %692 }
0x1180   :  { %v695_v44 = vmul.f32 %v2785_v41, %v693_v43 }
0x1182   :  { %697 = vrot.lane.b32.xlu1 %v695_v44, %s2929_s13 }
0x1186   :  { %246 = vrot.lane.b32.xlu1 %v3047_v29, %s2930_s3  ;;  %v2723_v29 = vld [vmem:[%s3551_s4] sm:$0xff]  }
0x1187   :  { %2552 = vmatprep.subr.bf16.mxu0 %v2723_v29 }
0x1188   :  { %2553 = vmatpush3.bf16.msra.mxu0 %v2723_v29 }
0x1189   :  { %2578 = vmatprep.subr.bf16.mxu0 %v2926_v1 }
0x118a   :  { %400 = vrot.lane.b32.xlu1 %v3100_v20, %s2930_s3 }
0x11f4   :  { %v698_v45 = vpop.permute.xlu1 %697 }
0x11f5   :  { %v3164_v46 = vadd.f32 %v698_v45, %v690_v57 }
0x11f7   :  { %2786 = vtanh.f32 %v3164_v46 }
0x11f8   :  { %v247_v47 = vpop.permute.xlu1 %246 }
0x11f9   :  { %249 = vst.msk [vmem:[#allocation2] sm:$0xff] %vm176_vm3, %v247_v47 }
0x11fc   :  { %v401_v48 = vpop.permute.xlu1 %400 }
0x11fd   :  { %403 = vst.msk [vmem:[#allocation2 + $0x10] sm:$0xff] %vm176_vm3, %v401_v48 }
0x1200   :  { %v789_v56 = vld [vmem:[#allocation2] sm:$0xff] }
0x1204   :  { %v2787_v20 = vpop.eup %2786 }
0x1205   :  { %703 = vrot.lane.b32.xlu0 %v2787_v20, %s2929_s13 }
0x1209   :  { %323 = vrot.lane.b32.xlu0 %v3075_v54, %s2930_s3 }
0x120d   :  { %477 = vrot.lane.b32.xlu0 %v3117_v42, %s2930_s3  ;;  %v791_v42 = vld [vmem:[#allocation2 + $0x10] sm:$0xff] }
0x1277   :  { %v704_v50 = vpop.permute.xlu0 %703 }
0x1278   :  { %v3181_v51 = vmul.f32 %v2785_v41, %v704_v50 }
0x127a   :  { %v712_v52 = vpack.c.bf16 %v3181_v51, %v3181_v51 }
0x127b   :  { %v324_v53 = vpop.permute.xlu0 %323 }
0x127c   :  { %326 = vst.msk [vmem:[#allocation2 + $0x8] sm:$0xff] %vm176_vm3, %v324_v53  ;;  %714 = vrot.lane.b32.xlu1 %v712_v52, %s2930_s3 }
0x127f   :  { %v478_v55 = vpop.permute.xlu0 %477 }
0x1280   :  { %480 = vst.msk [vmem:[#allocation2 + $0x18] sm:$0xff] %vm176_vm3, %v478_v55 }
0x1283   :  { %v790_v61 = vld [vmem:[#allocation2 + $0x8] sm:$0xff] }
0x1284   :  { %v797_v54 = vpack.c.bf16 %v790_v61, %v789_v56 }
0x1286   :  { %2554 = vmatprep.mubr.msk.bf16.mxu0 %vm176_vm3, %v797_v54 }
0x1287   :  { %v792_v62 = vld [vmem:[#allocation2 + $0x18] sm:$0xff] }
0x1288   :  { %v798_v58 = vpack.c.bf16 %v792_v62, %v791_v42 }
0x128a   :  { %2555 = vmatmul.mubr.msk.bf16.vlgmr.msra.gmra.mxu0 %vm176_vm3, %v798_v58 }
0x128b   :  { %2579 = vmatpush3.bf16.msra.mxu0 %v3192_v63 }
0x128c   :  { %2580 = vmatprep.subr.bf16.mxu0 %v2926_v1 }
0x128f   :  { %2581 = vmatpush3.bf16.msra.mxu0 %v3200_v0 }
0x1290   :  { %2594 = vmatprep.subr.bf16.mxu0 %v2926_v1 }
0x12ee   :  { %v715_v2 = vpop.permute.xlu1 %714 }
0x12ef   :  { %2547 = vmatmul.mubr.msk.bf16.vlgmr.msra.gmra.mxu1 %vm176_vm3, %v715_v2 }
0x12f0   :  { %2563 = vmatpush3.bf16.msra.mxu1 %v3192_v63  ;;  %2566 = vmatprep.mubr.msk.bf16.mxu1 %vm2927_vm2, %v2926_v1 }
0x12f1   :  { %2564 = vmatprep.subr.bf16.mxu1 %v2926_v1 }
0x12f4   :  { %2565 = vmatpush3.bf16.msra.mxu1 %v3200_v0 }
0x12f5   :  { %2570 = vmatprep.subr.bf16.mxu1 %v2926_v1 }
0x12f7   :  { %2567 = vmatmul.mubr.bf16.vlgmr.msra.gmra.mxu1 %v2928_v7 }
0x12f8   :  { %2571 = vmatpush3.bf16.msra.mxu1 %v3192_v63  ;;  %2574 = vmatprep.mubr.msk.bf16.mxu1 %vm2927_vm2, %v2926_v1 }
0x12f9   :  { %2572 = vmatprep.subr.bf16.mxu1 %v2926_v1 }
0x12fc   :  { %2573 = vmatpush3.bf16.msra.mxu1 %v3200_v0 }
0x12fd   :  { %2586 = vmatprep.subr.bf16.mxu1 %v2926_v1 }
0x134a   :  { %v3220_v10 = vpop.f32.mrf.mxu0 }
0x134c   :  { %v870_v14 = vpop.f32.mrf.mxu0 }
0x134d   :  { %v871_v17 = vadd.f32 %v3225_v8, %v870_v14 }
0x134e   :  { %v3253_v29 = vpop.f32.mrf.mxu0 }
0x1350   :  { %v873_v20 = vpop.f32.mrf.mxu0 }
0x1351   :  { %v874_v50 = vadd.f32 %v3225_v8, %v873_v20 }
0x13af   :  { %v753_v11 = vpop.f32.mrf.mxu1 }
0x13b0   :  { %v759_v12 = vadd.f32 %v753_v11, %v157_v4 }
0x13b1   :  { %v2548_v13 = vpop.f32.mrf.mxu1 }
0x13b2   :  { %v2331_v34 = vmul.f32 -1.442695, %v759_v12 }
0x13b3   :  { %v756_v15 = vpop.f32.mrf.mxu1 }
0x13b5   :  { %v2549_v16 = vpop.f32.mrf.mxu1 }
0x13b7   :  { %v951_v3 = vpop.f32.mrf.mxu1 }
0x13b8   :  { %v957_v18 = vadd.f32 %v951_v3, %v871_v17 }
0x13b9   :  { %v2568_v19 = vpop.f32.mrf.mxu1 }
0x13ba   :  { %2788 = vtanh.f32 %v957_v18  ;;  %v2341_v21 = vmul.f32 -1.442695, %v957_v18 }
0x13bb   :  { %v954_v9 = vpop.f32.mrf.mxu1 }
0x13bc   :  { %2790 = vpow2.f32 %v2341_v21 }
0x13bd   :  { %v2569_v59 = vpop.f32.mrf.mxu1 }
0x13c7   :  { %v2789_v6 = vpop.eup %2788 }
0x13c8   :  { %967 = vrot.lane.b32.xlu0 %v2789_v6, %s2929_s13 }
0x13c9   :  { %v2791_v22 = vpop.eup %2790 }
0x13ca   :  { %v961_v60 = vadd.f32 1.0, %v2791_v22 }
0x13cc   :  { %2792 = vrcp.f32 %v961_v60 }
0x13d9   :  { %v2793_v23 = vpop.eup %2792 }
0x13da   :  { %v965_v26 = vmul.f32 0.0, %v2793_v23 }
0x143a   :  { %v968_v24 = vpop.permute.xlu0 %967 }
0x143b   :  { %v970_v25 = vmul.f32 %v2793_v23, %v968_v24 }
0x143d   :  { %972 = vrot.lane.b32.xlu1 %v970_v25, %s2929_s13 }
0x14af   :  { %v973_v28 = vpop.permute.xlu1 %972 }
0x14b0   :  { %v975_v30 = vadd.f32 %v973_v28, %v965_v26  ;;  %v879_v26 = vadd.f32 %v3220_v10, %v3225_v8 }
0x14b2   :  { %2794 = vtanh.f32 %v975_v30 }
0x14b3   :  { %2796 = vtanh.f32 %v759_v12 }
0x14b4   :  { %2798 = vpow2.f32 %v2331_v34 }
0x14bf   :  { %v2795_v31 = vpop.eup %2794 }
0x14c0   :  { %978 = vrot.lane.b32.xlu0 %v2795_v31, %s2929_s13  ;;  %v2797_v33 = vpop.eup %2796 }
0x14c1   :  { %v2799_v35 = vpop.eup %2798 }
0x14c2   :  { %v763_v36 = vadd.f32 1.0, %v2799_v35 }
0x14c4   :  { %769 = vrot.lane.b32.xlu0 %v2797_v33, %s2929_s13  ;;  %2800 = vrcp.f32 %v763_v36 }
0x14d1   :  { %v2801_v39 = vpop.eup %2800 }
0x14d2   :  { %v767_v44 = vmul.f32 %v2801_v39, %v3164_v46 }
0x1532   :  { %v979_v37 = vpop.permute.xlu0 %978 }
0x1533   :  { %v3232_v32 = vmul.f32 %v2793_v23, %v979_v37 }
0x1535   :  { %v987_v38 = vpack.c.bf16 %v3232_v32, %v3232_v32 }
0x1536   :  { %v770_v40 = vpop.permute.xlu0 %769 }
0x1537   :  { %v772_v41 = vmul.f32 %v2801_v39, %v770_v40  ;;  %989 = vrot.lane.b32.xlu1 %v987_v38, %s2930_s3 }
0x1539   :  { %774 = vrot.lane.b32.xlu0 %v772_v41, %s2929_s13 }
0x15a9   :  { %v990_v43 = vpop.permute.xlu1 %989 }
0x15aa   :  { %2575 = vmatmul.mubr.msk.bf16.vlgmr.msra.gmra.mxu1 %vm176_vm3, %v990_v43 }
0x15ab   :  { %v775_v57 = vpop.permute.xlu0 %774  ;;  %2587 = vmatpush3.bf16.msra.mxu1 %v3192_v63  ;;  %2590 = vmatprep.mubr.msk.bf16.mxu1 %vm2927_vm2, %v2926_v1 }
0x15ac   :  { %v777_v45 = vadd.f32 %v775_v57, %v767_v44  ;;  %2588 = vmatprep.subr.bf16.mxu1 %v2926_v1 }
0x15ae   :  { %2802 = vtanh.f32 %v777_v45 }
0x15af   :  { %2589 = vmatpush3.bf16.msra.mxu1 %v3200_v0 }
0x15b0   :  { %2602 = vmatprep.subr.bf16.mxu1 %v2926_v1 }
0x15bb   :  { %v2803_v47 = vpop.eup %2802 }
0x15bc   :  { %780 = vrot.lane.b32.xlu0 %v2803_v47, %s2929_s13 }
0x15c0   :  { %554 = vrot.lane.b32.xlu0 %v3133_v5, %s2930_s3 }
0x15c4   :  { %708 = vrot.lane.b32.xlu0 %v3181_v51, %s2930_s3 }
0x162e   :  { %v781_v46 = vpop.permute.xlu0 %780 }
0x162f   :  { %v783_v14 = vmul.f32 %v2801_v39, %v781_v46 }
0x1632   :  { %v555_v48 = vpop.permute.xlu0 %554 }
0x1633   :  { %557 = vst.msk [vmem:[#allocation2 + $0x20] sm:$0xff] %vm176_vm3, %v555_v48 }
0x1636   :  { %v709_v49 = vpop.permute.xlu0 %708 }
0x1637   :  { %711 = vst.msk [vmem:[#allocation2 + $0x30] sm:$0xff] %vm176_vm3, %v709_v49  ;;  %v882_v49 = vadd.f32 %v3253_v29, %v3225_v8 }
0x163a   :  { %v793_v19 = vld [vmem:[#allocation2 + $0x20] sm:$0xff] }
0x163e   :  { %v795_v59 = vld [vmem:[#allocation2 + $0x30] sm:$0xff] }
0x166a   :  { %v1028_v52 = vpop.f32.mrf.mxu1 }
0x166b   :  { %v1034_v53 = vadd.f32 %v1028_v52, %v874_v50 }
0x166c   :  { %v2576_v55 = vpop.f32.mrf.mxu1 }
0x166d   :  { %2804 = vtanh.f32 %v1034_v53  ;;  %v2343_v51 = vmul.f32 -1.442695, %v1034_v53 }
0x166e   :  { %v1031_v5 = vpop.f32.mrf.mxu1 }
0x166f   :  { %2806 = vpow2.f32 %v2343_v51 }
0x1670   :  { %v2577_v56 = vpop.f32.mrf.mxu1 }
0x167a   :  { %v2805_v61 = vpop.eup %2804 }
0x167b   :  { %1044 = vrot.lane.b32.xlu1 %v2805_v61, %s2929_s13 }
0x167c   :  { %v2807_v54 = vpop.eup %2806 }
0x167d   :  { %v1038_v42 = vadd.f32 1.0, %v2807_v54 }
0x167f   :  { %2808 = vrcp.f32 %v1038_v42 }
0x168c   :  { %v2809_v62 = vpop.eup %2808 }
0x168d   :  { %v1042_v4 = vmul.f32 %v2809_v62, %v975_v30 }
0x16ed   :  { %v1045_v58 = vpop.permute.xlu1 %1044 }
0x16ee   :  { %v1047_v2 = vmul.f32 %v2809_v62, %v1045_v58 }
0x16f0   :  { %1049 = vrot.lane.b32.xlu1 %v1047_v2, %s2929_s13 }
0x1762   :  { %v1050_v11 = vpop.permute.xlu1 %1049 }
0x1763   :  { %v1052_v12 = vadd.f32 %v1050_v11, %v1042_v4 }
0x1765   :  { %2810 = vtanh.f32 %v1052_v12 }
0x1772   :  { %v2811_v13 = vpop.eup %2810 }
0x1773   :  { %1055 = vrot.lane.b32.xlu1 %v2811_v13, %s2929_s13 }
0x1777   :  { %631 = vrot.lane.b32.xlu1 %v3150_v27, %s2930_s3 }
0x177b   :  { %785 = vrot.lane.b32.xlu1 %v783_v14, %s2930_s3 }
0x17e5   :  { %v1056_v15 = vpop.permute.xlu1 %1055 }
0x17e6   :  { %v3262_v16 = vmul.f32 %v2809_v62, %v1056_v15 }
0x17e8   :  { %v1064_v17 = vpack.c.bf16 %v3262_v16, %v3262_v16 }
0x17e9   :  { %v632_v3 = vpop.permute.xlu1 %631 }
0x17ea   :  { %634 = vst.msk [vmem:[#allocation2 + $0x28] sm:$0xff] %vm176_vm3, %v632_v3  ;;  %1066 = vrot.lane.b32.xlu0 %v1064_v17, %s2930_s3 }
0x17ed   :  { %v786_v18 = vpop.permute.xlu1 %785 }
0x17ee   :  { %788 = vst.msk [vmem:[#allocation2 + $0x38] sm:$0xff] %vm176_vm3, %v786_v18 }
0x17f1   :  { %v794_v9 = vld [vmem:[#allocation2 + $0x28] sm:$0xff] }
0x17f2   :  { %v799_v27 = vpack.c.bf16 %v794_v9, %v793_v19 }
0x17f4   :  { %2558 = vmatprep.mubr.msk.bf16.mxu0 %vm176_vm3, %v799_v27 }
0x17f5   :  { %v796_v6 = vld [vmem:[#allocation2 + $0x38] sm:$0xff] }
0x17f6   :  { %v800_v21 = vpack.c.bf16 %v796_v6, %v795_v59 }
0x17f8   :  { %2559 = vmatmul.mubr.msk.bf16.gmra.mxu0 %vm176_vm3, %v800_v21 }
0x17f9   :  { %2582 = vmatprep.mubr.msk.bf16.mxu0 %vm2927_vm2, %v2926_v1 }
0x185c   :  { %v1067_v22 = vpop.permute.xlu0 %1066 }
0x185d   :  { %2583 = vmatmul.mubr.msk.bf16.vlgmr.msra.gmra.mxu0 %vm176_vm3, %v1067_v22 }
0x185e   :  { %2595 = vmatpush3.bf16.msra.mxu0 %v3192_v63  ;;  %2598 = vmatprep.mubr.msk.bf16.mxu0 %vm2927_vm2, %v2926_v1 }
0x185f   :  { %2596 = vmatprep.subr.bf16.mxu0 %v2926_v1 }
0x1862   :  { %2597 = vmatpush3.bf16.msra.mxu0 %v3200_v0 }
0x1863   :  { %2610 = vmatprep.subr.bf16.mxu0 %v2926_v1 }
0x18b8   :  { %v3280_v60 = vpop.f32.mrf.mxu0 }
0x18ba   :  { %v3282_v23 = vpop.f32.mrf.mxu0 }
0x18bb   :  { %v887_v15 = vadd.f32 %v3225_v8, %v3282_v23 }
0x18bc   :  { %v3284_v24 = vpop.f32.mrf.mxu0 }
0x18be   :  { %v3286_v25 = vpop.f32.mrf.mxu0 }
0x191d   :  { %v1105_v28 = vpop.f32.mrf.mxu0 }
0x191e   :  { %v1111_v30 = vadd.f32 %v1105_v28, %v879_v26 }
0x191f   :  { %v2584_v31 = vpop.f32.mrf.mxu0 }
0x1920   :  { %2812 = vtanh.f32 %v1111_v30  ;;  %v2345_v36 = vmul.f32 -1.442695, %v1111_v30 }
0x1921   :  { %v1108_v33 = vpop.f32.mrf.mxu0 }
0x1922   :  { %2814 = vpow2.f32 %v2345_v36 }
0x1923   :  { %v2585_v34 = vpop.f32.mrf.mxu0 }
0x192d   :  { %v2813_v35 = vpop.eup %2812 }
0x192e   :  { %1121 = vrot.lane.b32.xlu1 %v2813_v35, %s2929_s13 }
0x192f   :  { %v2815_v37 = vpop.eup %2814 }
0x1930   :  { %v1115_v38 = vadd.f32 1.0, %v2815_v37 }
0x1932   :  { %2816 = vrcp.f32 %v1115_v38  ;;  %v890_v38 = vadd.f32 %v3225_v8, %v3286_v25 }
0x193f   :  { %v2817_v39 = vpop.eup %2816 }
0x1940   :  { %v1119_v10 = vmul.f32 %v2817_v39, %v1052_v12 }
0x19a0   :  { %v1122_v40 = vpop.permute.xlu1 %1121 }
0x19a1   :  { %v1124_v41 = vmul.f32 %v2817_v39, %v1122_v40 }
0x19a3   :  { %1126 = vrot.lane.b32.xlu0 %v1124_v41, %s2929_s13 }
0x1a15   :  { %v1127_v43 = vpop.permute.xlu0 %1126 }
0x1a16   :  { %v1129_v44 = vadd.f32 %v1127_v43, %v1119_v10 }
0x1a18   :  { %2818 = vtanh.f32 %v1129_v44 }
0x1a25   :  { %v2819_v57 = vpop.eup %2818 }
0x1a26   :  { %1132 = vrot.lane.b32.xlu1 %v2819_v57, %s2929_s13 }
0x1a98   :  { %v1133_v45 = vpop.permute.xlu1 %1132 }
0x1a99   :  { %v3293_v47 = vmul.f32 %v2817_v39, %v1133_v45 }
0x1a9b   :  { %v1141_v46 = vpack.c.bf16 %v3293_v47, %v3293_v47 }
0x1a9d   :  { %1143 = vrot.lane.b32.xlu0 %v1141_v46, %s2930_s3 }
0x1b0f   :  { %v1144_v48 = vpop.permute.xlu0 %1143 }
0x1b10   :  { %2591 = vmatmul.mubr.msk.bf16.vlgmr.msra.gmra.mxu1 %vm176_vm3, %v1144_v48 }
0x1b11   :  { %2603 = vmatpush3.bf16.msra.mxu1 %v3192_v63  ;;  %2606 = vmatprep.mubr.msk.bf16.mxu1 %vm2927_vm2, %v2926_v1 }
0x1b12   :  { %2604 = vmatprep.subr.bf16.mxu1 %v2926_v1 }
0x1b15   :  { %2605 = vmatpush3.bf16.msra.mxu1 %v3200_v0 }
0x1b16   :  { %2618 = vmatprep.subr.bf16.mxu1 %v2926_v1 }
0x1bd0   :  { %v1182_v20 = vpop.f32.mrf.mxu1 }
0x1bd1   :  { %v1188_v50 = vadd.f32 %v1182_v20, %v882_v49 }
0x1bd2   :  { %v2592_v52 = vpop.f32.mrf.mxu1 }
0x1bd3   :  { %2820 = vtanh.f32 %v1188_v50  ;;  %v2347_v56 = vmul.f32 -1.442695, %v1188_v50 }
0x1bd4   :  { %v1185_v53 = vpop.f32.mrf.mxu1 }
0x1bd5   :  { %2822 = vpow2.f32 %v2347_v56  ;;  %v895_v56 = vadd.f32 %v3280_v60, %v3225_v8 }
0x1bd6   :  { %v2593_v55 = vpop.f32.mrf.mxu1 }
0x1be0   :  { %v2821_v5 = vpop.eup %2820 }
0x1be1   :  { %1198 = vrot.lane.b32.xlu1 %v2821_v5, %s2929_s13 }
0x1be2   :  { %v2823_v61 = vpop.eup %2822 }
0x1be3   :  { %v1192_v51 = vadd.f32 1.0, %v2823_v61 }
0x1be5   :  { %2824 = vrcp.f32 %v1192_v51 }
0x1bf2   :  { %v2825_v54 = vpop.eup %2824 }
0x1bf3   :  { %v1196_v29 = vmul.f32 %v2825_v54, %v1129_v44 }
0x1c53   :  { %v1199_v42 = vpop.permute.xlu1 %1198 }
0x1c54   :  { %v1201_v62 = vmul.f32 %v2825_v54, %v1199_v42 }
0x1c56   :  { %1203 = vrot.lane.b32.xlu0 %v1201_v62, %s2929_s13 }
0x1cc8   :  { %v1204_v58 = vpop.permute.xlu0 %1203 }
0x1cc9   :  { %v1206_v2 = vadd.f32 %v1204_v58, %v1196_v29 }
0x1ccb   :  { %2826 = vtanh.f32 %v1206_v2 }
0x1cd8   :  { %v2827_v4 = vpop.eup %2826 }
0x1cd9   :  { %1209 = vrot.lane.b32.xlu1 %v2827_v4, %s2929_s13 }
0x1d4b   :  { %v1210_v11 = vpop.permute.xlu1 %1209 }
0x1d4c   :  { %v3310_v12 = vmul.f32 %v2825_v54, %v1210_v11 }
0x1d4e   :  { %v1218_v13 = vpack.c.bf16 %v3310_v12, %v3310_v12 }
0x1d50   :  { %1220 = vrot.lane.b32.xlu0 %v1218_v13, %s2930_s3 }
0x1dc2   :  { %v1221_v14 = vpop.permute.xlu0 %1220 }
0x1dc3   :  { %2599 = vmatmul.mubr.msk.bf16.vlgmr.msra.gmra.mxu0 %vm176_vm3, %v1221_v14 }
0x1dc4   :  { %2611 = vmatpush3.bf16.msra.mxu0 %v3192_v63  ;;  %2614 = vmatprep.mubr.msk.bf16.mxu0 %vm2927_vm2, %v2926_v1 }
0x1dc5   :  { %2612 = vmatprep.subr.bf16.mxu0 %v2926_v1 }
0x1dc8   :  { %2613 = vmatpush3.bf16.msra.mxu0 %v3200_v0 }
0x1e83   :  { %v1259_v17 = vpop.f32.mrf.mxu0 }
0x1e84   :  { %v1265_v3 = vadd.f32 %v1259_v17, %v887_v15 }
0x1e85   :  { %v2600_v18 = vpop.f32.mrf.mxu0 }
0x1e86   :  { %2828 = vtanh.f32 %v1265_v3  ;;  %v2349_v59 = vmul.f32 -1.442695, %v1265_v3 }
0x1e87   :  { %v1262_v19 = vpop.f32.mrf.mxu0 }
0x1e88   :  { %2830 = vpow2.f32 %v2349_v59  ;;  %v2726_v19 = vld [vmem:[%s3554_s7 + $0x8] sm:$0xff]  }
0x1e89   :  { %v2601_v9 = vpop.f32.mrf.mxu0  ;;  %2626 = vmatprep.subr.bf16.mxu0 %v2726_v19 }
0x1e93   :  { %v2829_v27 = vpop.eup %2828 }
0x1e94   :  { %1275 = vrot.lane.b32.xlu1 %v2829_v27, %s2929_s13 }
0x1e95   :  { %v2831_v6 = vpop.eup %2830 }
0x1e96   :  { %v1269_v21 = vadd.f32 1.0, %v2831_v6 }
0x1e98   :  { %2832 = vrcp.f32 %v1269_v21 }
0x1ea5   :  { %v2833_v22 = vpop.eup %2832 }
0x1ea6   :  { %v1273_v23 = vmul.f32 %v2833_v22, %v1206_v2 }
0x1f06   :  { %v1276_v26 = vpop.permute.xlu1 %1275 }
0x1f07   :  { %v1278_v28 = vmul.f32 %v2833_v22, %v1276_v26 }
0x1f09   :  { %1280 = vrot.lane.b32.xlu0 %v1278_v28, %s2929_s13 }
0x1f7b   :  { %v1281_v30 = vpop.permute.xlu0 %1280 }
0x1f7c   :  { %v1283_v31 = vadd.f32 %v1281_v30, %v1273_v23  ;;  %v3385_v30 = vld [vmem:[%s3555_s8 + $0x8] sm:$0xff]  }
0x1f7e   :  { %2834 = vtanh.f32 %v1283_v31 }
0x1f8b   :  { %v2835_v33 = vpop.eup %2834 }
0x1f8c   :  { %1286 = vrot.lane.b32.xlu1 %v2835_v33, %s2929_s13 }
0x1ffe   :  { %v1287_v34 = vpop.permute.xlu1 %1286 }
0x1fff   :  { %v3326_v35 = vmul.f32 %v2833_v22, %v1287_v34  ;;  %v898_v34 = vadd.f32 %v3284_v24, %v3225_v8 }
0x2001   :  { %v1295_v36 = vpack.c.bf16 %v3326_v35, %v3326_v35 }
0x2003   :  { %1297 = vrot.lane.b32.xlu0 %v1295_v36, %s2930_s3 }
0x2075   :  { %v1298_v37 = vpop.permute.xlu0 %1297 }
0x2076   :  { %2607 = vmatmul.mubr.msk.bf16.vlgmr.msra.gmra.mxu1 %vm176_vm3, %v1298_v37 }
0x2077   :  { %2619 = vmatpush3.bf16.msra.mxu1 %v3192_v63  ;;  %2622 = vmatprep.mubr.msk.bf16.mxu1 %vm2927_vm2, %v2926_v1 }
0x2078   :  { %2620 = vmatprep.subr.bf16.mxu1 %v2926_v1 }
0x207b   :  { %2621 = vmatpush3.bf16.msra.mxu1 %v3200_v0 }
0x207c   :  { %2638 = vmatprep.subr.bf16.mxu1 %v2926_v1 }
0x2136   :  { %v1336_v39 = vpop.f32.mrf.mxu1 }
0x2137   :  { %v1342_v40 = vadd.f32 %v1336_v39, %v890_v38 }
0x2138   :  { %v2608_v41 = vpop.f32.mrf.mxu1 }
0x2139   :  { %2836 = vtanh.f32 %v1342_v40  ;;  %v2351_v63 = vmul.f32 -1.442695, %v1342_v40  ;;  %v3418_v41 = vld [vmem:[%s3556_s9] ss:$0 sm:$0xff] }
0x213a   :  { %v1339_v10 = vpop.f32.mrf.mxu1 }
0x213b   :  { %2838 = vpow2.f32 %v2351_v63 }
0x213c   :  { %v2609_v43 = vpop.f32.mrf.mxu1 }
0x2146   :  { %v2837_v44 = vpop.eup %2836 }
0x2147   :  { %1352 = vrot.lane.b32.xlu1 %v2837_v44, %s2929_s13 }
0x2148   :  { %v2839_v57 = vpop.eup %2838 }
0x2149   :  { %v1346_v45 = vadd.f32 1.0, %v2839_v57 }
0x214b   :  { %2840 = vrcp.f32 %v1346_v45 }
0x2158   :  { %v2841_v0 = vpop.eup %2840 }
0x2159   :  { %v1350_v25 = vmul.f32 %v2841_v0, %v1283_v31  ;;  %v3393_v31 = vld [vmem:[%s3555_s8] sm:$0xff]  }
0x21b9   :  { %v1353_v46 = vpop.permute.xlu1 %1352 }
0x21ba   :  { %v1355_v48 = vmul.f32 %v2841_v0, %v1353_v46 }
0x21bc   :  { %1357 = vrot.lane.b32.xlu0 %v1355_v48, %s2929_s13 }
0x222e   :  { %v1358_v49 = vpop.permute.xlu0 %1357 }
0x222f   :  { %v1360_v20 = vadd.f32 %v1358_v49, %v1350_v25 }
0x2231   :  { %2842 = vtanh.f32 %v1360_v20 }
0x223e   :  { %v2843_v50 = vpop.eup %2842 }
0x223f   :  { %1363 = vrot.lane.b32.xlu1 %v2843_v50, %s2929_s13 }
0x22b1   :  { %v1364_v52 = vpop.permute.xlu1 %1363 }
0x22b2   :  { %v3343_v53 = vmul.f32 %v2841_v0, %v1364_v52 }
0x22b4   :  { %v1372_v55 = vpack.c.bf16 %v3343_v53, %v3343_v53 }
0x22b6   :  { %1374 = vrot.lane.b32.xlu0 %v1372_v55, %s2930_s3 }
0x2328   :  { %v1375_v5 = vpop.permute.xlu0 %1374 }
0x2329   :  { %2615 = vmatmul.mubr.msk.bf16.vlgmr.msra.gmra.mxu0 %vm176_vm3, %v1375_v5 }
0x232a   :  { %2627 = vmatpush3.bf16.msra.mxu0 %v2726_v19 }
0x23e9   :  { %v1413_v61 = vpop.f32.mrf.mxu0 }
0x23ea   :  { %v1419_v51 = vadd.f32 %v1413_v61, %v895_v56 }
0x23eb   :  { %v2616_v54 = vpop.f32.mrf.mxu0 }
0x23ec   :  { %2844 = vtanh.f32 %v1419_v51  ;;  %v2353_v58 = vmul.f32 -1.442695, %v1419_v51 }
0x23ed   :  { %v1416_v42 = vpop.f32.mrf.mxu0 }
0x23ee   :  { %2846 = vpow2.f32 %v2353_v58 }
0x23ef   :  { %v2617_v62 = vpop.f32.mrf.mxu0 }
0x23f9   :  { %v2845_v29 = vpop.eup %2844 }
0x23fa   :  { %1429 = vrot.lane.b32.xlu1 %v2845_v29, %s2929_s13 }
0x23fb   :  { %v2847_v2 = vpop.eup %2846 }
0x23fc   :  { %v1423_v4 = vadd.f32 1.0, %v2847_v2 }
0x23fe   :  { %2848 = vrcp.f32 %v1423_v4 }
0x240b   :  { %v2849_v11 = vpop.eup %2848 }
0x240c   :  { %v1427_v60 = vmul.f32 %v2849_v11, %v1360_v20 }
0x246c   :  { %v1430_v13 = vpop.permute.xlu1 %1429 }
0x246d   :  { %v1432_v14 = vmul.f32 %v2849_v11, %v1430_v13 }
0x246f   :  { %1434 = vrot.lane.b32.xlu0 %v1432_v14, %s2929_s13 }
0x2473   :  { %983 = vrot.lane.b32.xlu0 %v3232_v32, %s2930_s3  ;;  %v2727_v32 = vld [vmem:[%s3554_s7] sm:$0xff]  }
0x2474   :  { %2628 = vmatprep.subr.bf16.mxu0 %v2727_v32 }
0x2475   :  { %2629 = vmatpush3.bf16.msra.mxu0 %v2727_v32 }
0x2476   :  { %2654 = vmatprep.subr.bf16.mxu0 %v2926_v1 }
0x2477   :  { %1137 = vrot.lane.b32.xlu0 %v3293_v47, %s2930_s3 }
0x24e1   :  { %v1435_v15 = vpop.permute.xlu0 %1434 }
0x24e2   :  { %v3357_v17 = vadd.f32 %v1435_v15, %v1427_v60 }
0x24e4   :  { %2850 = vtanh.f32 %v3357_v17 }
0x24e5   :  { %v984_v3 = vpop.permute.xlu0 %983 }
0x24e6   :  { %986 = vst.msk [vmem:[#allocation2] sm:$0xff] %vm176_vm3, %v984_v3 }
0x24e9   :  { %v1138_v18 = vpop.permute.xlu0 %1137 }
0x24ea   :  { %1140 = vst.msk [vmem:[#allocation2 + $0x10] sm:$0xff] %vm176_vm3, %v1138_v18 }
0x24f1   :  { %v2851_v47 = vpop.eup %2850 }
0x24f2   :  { %1440 = vrot.lane.b32.xlu1 %v2851_v47, %s2929_s13 }
0x24f6   :  { %1060 = vrot.lane.b32.xlu1 %v3262_v16, %s2930_s3  ;;  %v1526_v16 = vld [vmem:[#allocation2] sm:$0xff] }
0x24fa   :  { %1214 = vrot.lane.b32.xlu1 %v3310_v12, %s2930_s3  ;;  %v1528_v12 = vld [vmem:[#allocation2 + $0x10] sm:$0xff] }
0x2564   :  { %v1441_v9 = vpop.permute.xlu1 %1440 }
0x2565   :  { %v3374_v27 = vmul.f32 %v2849_v11, %v1441_v9 }
0x2567   :  { %v1449_v59 = vpack.c.bf16 %v3374_v27, %v3374_v27 }
0x2568   :  { %v1061_v6 = vpop.permute.xlu1 %1060 }
0x2569   :  { %1063 = vst.msk [vmem:[#allocation2 + $0x8] sm:$0xff] %vm176_vm3, %v1061_v6  ;;  %1451 = vrot.lane.b32.xlu0 %v1449_v59, %s2930_s3 }
0x256c   :  { %v1215_v21 = vpop.permute.xlu1 %1214 }
0x256d   :  { %1217 = vst.msk [vmem:[#allocation2 + $0x18] sm:$0xff] %vm176_vm3, %v1215_v21 }
0x2570   :  { %v1527_v22 = vld [vmem:[#allocation2 + $0x8] sm:$0xff] }
0x2571   :  { %v1534_v26 = vpack.c.bf16 %v1527_v22, %v1526_v16 }
0x2573   :  { %2630 = vmatprep.mubr.msk.bf16.mxu0 %vm176_vm3, %v1534_v26 }
0x2574   :  { %v1529_v28 = vld [vmem:[#allocation2 + $0x18] sm:$0xff] }
0x2575   :  { %v1535_v23 = vpack.c.bf16 %v1529_v28, %v1528_v12 }
0x2577   :  { %2631 = vmatmul.mubr.msk.bf16.vlgmr.msra.gmra.mxu0 %vm176_vm3, %v1535_v23 }
0x2578   :  { %2655 = vmatpush3.bf16.msra.mxu0 %v3385_v30 }
0x2579   :  { %2656 = vmatprep.subr.bf16.mxu0 %v2926_v1 }
0x257c   :  { %2657 = vmatpush3.bf16.msra.mxu0 %v3393_v31 }
0x257d   :  { %2670 = vmatprep.subr.bf16.mxu0 %v2926_v1 }
0x25db   :  { %v1452_v33 = vpop.permute.xlu0 %1451 }
0x25dc   :  { %2623 = vmatmul.mubr.msk.bf16.vlgmr.msra.gmra.mxu1 %vm176_vm3, %v1452_v33 }
0x25dd   :  { %2639 = vmatpush3.bf16.msra.mxu1 %v3385_v30  ;;  %2642 = vmatprep.mubr.msk.bf16.mxu1 %vm2927_vm2, %v2926_v1 }
0x25de   :  { %2640 = vmatprep.subr.bf16.mxu1 %v2926_v1 }
0x25e1   :  { %2641 = vmatpush3.bf16.msra.mxu1 %v3393_v31 }
0x25e2   :  { %2646 = vmatprep.subr.bf16.mxu1 %v2926_v1 }
0x25e4   :  { %2643 = vmatmul.mubr.bf16.vlgmr.msra.gmra.mxu1 %v2928_v7 }
0x25e5   :  { %2647 = vmatpush3.bf16.msra.mxu1 %v3385_v30  ;;  %2650 = vmatprep.mubr.msk.bf16.mxu1 %vm2927_vm2, %v2926_v1 }
0x25e6   :  { %2648 = vmatprep.subr.bf16.mxu1 %v2926_v1 }
0x25e9   :  { %2649 = vmatpush3.bf16.msra.mxu1 %v3393_v31 }
0x25ea   :  { %2662 = vmatprep.subr.bf16.mxu1 %v2926_v1 }
0x2637   :  { %v3413_v36 = vpop.f32.mrf.mxu0 }
0x2639   :  { %v1607_v7 = vpop.f32.mrf.mxu0 }
0x263a   :  { %v1608_v43 = vadd.f32 %v3418_v41, %v1607_v7 }
0x263b   :  { %v3442_v19 = vpop.f32.mrf.mxu0 }
0x263d   :  { %v1610_v32 = vpop.f32.mrf.mxu0 }
0x263e   :  { %v1611_v47 = vadd.f32 %v3418_v41, %v1610_v32 }
0x269c   :  { %v1490_v37 = vpop.f32.mrf.mxu1 }
0x269d   :  { %v1496_v38 = vadd.f32 %v1490_v37, %v898_v34 }
0x269e   :  { %v2624_v39 = vpop.f32.mrf.mxu1 }
0x269f   :  { %v2355_v61 = vmul.f32 -1.442695, %v1496_v38 }
0x26a0   :  { %v1493_v40 = vpop.f32.mrf.mxu1 }
0x26a2   :  { %v2625_v10 = vpop.f32.mrf.mxu1 }
0x26a4   :  { %v1688_v44 = vpop.f32.mrf.mxu1 }
0x26a5   :  { %v1694_v63 = vadd.f32 %v1688_v44, %v1608_v43 }
0x26a6   :  { %v2644_v57 = vpop.f32.mrf.mxu1 }
0x26a7   :  { %2852 = vtanh.f32 %v1694_v63  ;;  %v2365_v0 = vmul.f32 -1.442695, %v1694_v63 }
0x26a8   :  { %v1691_v8 = vpop.f32.mrf.mxu1 }
0x26a9   :  { %2854 = vpow2.f32 %v2365_v0 }
0x26aa   :  { %v2645_v24 = vpop.f32.mrf.mxu1 }
0x26b4   :  { %v2853_v45 = vpop.eup %2852 }
0x26b5   :  { %1704 = vrot.lane.b32.xlu1 %v2853_v45, %s2929_s13 }
0x26b6   :  { %v2855_v46 = vpop.eup %2854 }
0x26b7   :  { %v1698_v48 = vadd.f32 1.0, %v2855_v46 }
0x26b9   :  { %2856 = vrcp.f32 %v1698_v48 }
0x26c6   :  { %v2857_v25 = vpop.eup %2856 }
0x26c7   :  { %v1702_v50 = vmul.f32 0.0, %v2857_v25 }
0x2727   :  { %v1705_v49 = vpop.permute.xlu1 %1704 }
0x2728   :  { %v1707_v20 = vmul.f32 %v2857_v25, %v1705_v49 }
0x272a   :  { %1709 = vrot.lane.b32.xlu0 %v1707_v20, %s2929_s13  ;;  %v1616_v20 = vadd.f32 %v3413_v36, %v3418_v41 }
0x279c   :  { %v1710_v52 = vpop.permute.xlu0 %1709 }
0x279d   :  { %v1712_v55 = vadd.f32 %v1710_v52, %v1702_v50 }
0x279f   :  { %2858 = vtanh.f32 %v1712_v55 }
0x27a0   :  { %2860 = vtanh.f32 %v1496_v38 }
0x27a1   :  { %2862 = vpow2.f32 %v2355_v61 }
0x27ac   :  { %v2859_v5 = vpop.eup %2858 }
0x27ad   :  { %1715 = vrot.lane.b32.xlu1 %v2859_v5, %s2929_s13  ;;  %v2861_v56 = vpop.eup %2860 }
0x27ae   :  { %v2863_v51 = vpop.eup %2862 }
0x27af   :  { %v1500_v54 = vadd.f32 1.0, %v2863_v51 }
0x27b1   :  { %1506 = vrot.lane.b32.xlu1 %v2861_v56, %s2929_s13  ;;  %2864 = vrcp.f32 %v1500_v54 }
0x27be   :  { %v2865_v58 = vpop.eup %2864 }
0x27bf   :  { %v1504_v13 = vmul.f32 %v2865_v58, %v3357_v17 }
0x281f   :  { %v1716_v42 = vpop.permute.xlu1 %1715 }
0x2820   :  { %v1718_v62 = vmul.f32 %v2857_v25, %v1716_v42 }
0x2822   :  { %v1719_v29 = vpack.c.bf16 %v1718_v62, %v1718_v62 }
0x2823   :  { %v1507_v2 = vpop.permute.xlu1 %1506 }
0x2824   :  { %v1509_v4 = vmul.f32 %v2865_v58, %v1507_v2  ;;  %1721 = vrot.lane.b32.xlu0 %v1719_v29, %s2930_s3 }
0x2826   :  { %1511 = vrot.lane.b32.xlu1 %v1509_v4, %s2929_s13 }
0x2896   :  { %v1722_v11 = vpop.permute.xlu0 %1721 }
0x2897   :  { %2651 = vmatmul.mubr.msk.bf16.vlgmr.msra.gmra.mxu1 %vm176_vm3, %v1722_v11 }
0x2898   :  { %v1512_v14 = vpop.permute.xlu1 %1511  ;;  %2663 = vmatpush3.bf16.msra.mxu1 %v3385_v30  ;;  %2666 = vmatprep.mubr.msk.bf16.mxu1 %vm2927_vm2, %v2926_v1 }
0x2899   :  { %v1514_v60 = vadd.f32 %v1512_v14, %v1504_v13  ;;  %2664 = vmatprep.subr.bf16.mxu1 %v2926_v1 }
0x289b   :  { %2866 = vtanh.f32 %v1514_v60 }
0x289c   :  { %2665 = vmatpush3.bf16.msra.mxu1 %v3393_v31 }
0x289d   :  { %2678 = vmatprep.subr.bf16.mxu1 %v2926_v1 }
0x28a8   :  { %v2867_v15 = vpop.eup %2866 }
0x28a9   :  { %1517 = vrot.lane.b32.xlu1 %v2867_v15, %s2929_s13 }
0x28ad   :  { %1291 = vrot.lane.b32.xlu1 %v3326_v35, %s2930_s3 }
0x28b1   :  { %1445 = vrot.lane.b32.xlu1 %v3374_v27, %s2930_s3 }
0x291b   :  { %v1518_v17 = vpop.permute.xlu1 %1517 }
0x291c   :  { %v1520_v39 = vmul.f32 %v2865_v58, %v1518_v17  ;;  %v1619_v17 = vadd.f32 %v3442_v19, %v3418_v41 }
0x291f   :  { %v1292_v3 = vpop.permute.xlu1 %1291 }
0x2920   :  { %1294 = vst.msk [vmem:[#allocation2 + $0x20] sm:$0xff] %vm176_vm3, %v1292_v3 }
0x2923   :  { %v1446_v18 = vpop.permute.xlu1 %1445 }
0x2924   :  { %1448 = vst.msk [vmem:[#allocation2 + $0x30] sm:$0xff] %vm176_vm3, %v1446_v18 }
0x2927   :  { %v1530_v63 = vld [vmem:[#allocation2 + $0x20] sm:$0xff] }
0x2957   :  { %v1760_v9 = vpop.f32.mrf.mxu1 }
0x2958   :  { %v1766_v59 = vadd.f32 %v1760_v9, %v1611_v47 }
0x2959   :  { %v2652_v6 = vpop.f32.mrf.mxu1 }
0x295a   :  { %2868 = vtanh.f32 %v1766_v59  ;;  %v2367_v27 = vmul.f32 -1.442695, %v1766_v59 }
0x295b   :  { %v1763_v35 = vpop.f32.mrf.mxu1 }
0x295c   :  { %2870 = vpow2.f32 %v2367_v27 }
0x295d   :  { %v2653_v21 = vpop.f32.mrf.mxu1 }
0x2967   :  { %v2869_v16 = vpop.eup %2868 }
0x2968   :  { %1776 = vrot.lane.b32.xlu0 %v2869_v16, %s2929_s13 }
0x2969   :  { %v2871_v22 = vpop.eup %2870 }
0x296a   :  { %v1770_v26 = vadd.f32 1.0, %v2871_v22 }
0x296c   :  { %2872 = vrcp.f32 %v1770_v26 }
0x2979   :  { %v2873_v12 = vpop.eup %2872 }
0x297a   :  { %v1774_v33 = vmul.f32 %v2873_v12, %v1712_v55 }
0x29da   :  { %v1777_v28 = vpop.permute.xlu0 %1776 }
0x29db   :  { %v1779_v23 = vmul.f32 %v2873_v12, %v1777_v28 }
0x29dd   :  { %1781 = vrot.lane.b32.xlu0 %v1779_v23, %s2929_s13 }
0x2a4f   :  { %v1782_v34 = vpop.permute.xlu0 %1781 }
0x2a50   :  { %v1784_v37 = vadd.f32 %v1782_v34, %v1774_v33 }
0x2a52   :  { %2874 = vtanh.f32 %v1784_v37 }
0x2a5f   :  { %v2875_v38 = vpop.eup %2874 }
0x2a60   :  { %1787 = vrot.lane.b32.xlu0 %v2875_v38, %s2929_s13 }
0x2a64   :  { %1368 = vrot.lane.b32.xlu0 %v3343_v53, %s2930_s3  ;;  %v1532_v53 = vld [vmem:[#allocation2 + $0x30] sm:$0xff] }
0x2a68   :  { %1522 = vrot.lane.b32.xlu0 %v1520_v39, %s2930_s3 }
0x2ad2   :  { %v1788_v7 = vpop.permute.xlu0 %1787 }
0x2ad3   :  { %v1790_v40 = vmul.f32 %v2873_v12, %v1788_v7 }
0x2ad5   :  { %v1791_v10 = vpack.c.bf16 %v1790_v40, %v1790_v40 }
0x2ad6   :  { %v1369_v43 = vpop.permute.xlu0 %1368 }
0x2ad7   :  { %1371 = vst.msk [vmem:[#allocation2 + $0x28] sm:$0xff] %vm176_vm3, %v1369_v43  ;;  %1793 = vrot.lane.b32.xlu1 %v1791_v10, %s2930_s3 }
0x2ada   :  { %v1523_v44 = vpop.permute.xlu0 %1522 }
0x2adb   :  { %1525 = vst.msk [vmem:[#allocation2 + $0x38] sm:$0xff] %vm176_vm3, %v1523_v44 }
0x2ade   :  { %v1531_v57 = vld [vmem:[#allocation2 + $0x28] sm:$0xff] }
0x2adf   :  { %v1536_v8 = vpack.c.bf16 %v1531_v57, %v1530_v63 }
0x2ae1   :  { %2634 = vmatprep.mubr.msk.bf16.mxu0 %vm176_vm3, %v1536_v8 }
0x2ae2   :  { %v1533_v24 = vld [vmem:[#allocation2 + $0x38] sm:$0xff] }
0x2ae3   :  { %v1537_v45 = vpack.c.bf16 %v1533_v24, %v1532_v53 }
0x2ae5   :  { %2635 = vmatmul.mubr.msk.bf16.gmra.mxu0 %vm176_vm3, %v1537_v45 }
0x2ae6   :  { %2658 = vmatprep.mubr.msk.bf16.mxu0 %vm2927_vm2, %v2926_v1 }
0x2b49   :  { %v1794_v0 = vpop.permute.xlu1 %1793 }
0x2b4a   :  { %2659 = vmatmul.mubr.msk.bf16.vlgmr.msra.gmra.mxu0 %vm176_vm3, %v1794_v0 }
0x2b4b   :  { %2671 = vmatpush3.bf16.msra.mxu0 %v3385_v30  ;;  %2674 = vmatprep.mubr.msk.bf16.mxu0 %vm2927_vm2, %v2926_v1 }
0x2b4c   :  { %2672 = vmatprep.subr.bf16.mxu0 %v2926_v1 }
0x2b4f   :  { %2673 = vmatpush3.bf16.msra.mxu0 %v3393_v31 }
0x2b50   :  { %2686 = vmatprep.subr.bf16.mxu0 %v2926_v1 }
0x2ba5   :  { %v3465_v46 = vpop.f32.mrf.mxu0 }
0x2ba7   :  { %v3467_v48 = vpop.f32.mrf.mxu0 }
0x2ba8   :  { %v1624_v38 = vadd.f32 %v3418_v41, %v3467_v48 }
0x2ba9   :  { %v3469_v25 = vpop.f32.mrf.mxu0 }
0x2bab   :  { %v3471_v49 = vpop.f32.mrf.mxu0 }
0x2c0a   :  { %v1832_v50 = vpop.f32.mrf.mxu0 }
0x2c0b   :  { %v1838_v52 = vadd.f32 %v1832_v50, %v1616_v20 }
0x2c0c   :  { %v2660_v55 = vpop.f32.mrf.mxu0 }
0x2c0d   :  { %2876 = vtanh.f32 %v1838_v52  ;;  %v2369_v51 = vmul.f32 -1.442695, %v1838_v52 }
0x2c0e   :  { %v1835_v5 = vpop.f32.mrf.mxu0 }
0x2c0f   :  { %2878 = vpow2.f32 %v2369_v51 }
0x2c10   :  { %v2661_v56 = vpop.f32.mrf.mxu0 }
0x2c1a   :  { %v2877_v61 = vpop.eup %2876 }
0x2c1b   :  { %1848 = vrot.lane.b32.xlu0 %v2877_v61, %s2929_s13  ;;  %v1627_v61 = vadd.f32 %v3418_v41, %v3471_v49 }
0x2c1c   :  { %v2879_v54 = vpop.eup %2878 }
0x2c1d   :  { %v1842_v42 = vadd.f32 1.0, %v2879_v54 }
0x2c1f   :  { %2880 = vrcp.f32 %v1842_v42 }
0x2c2c   :  { %v2881_v62 = vpop.eup %2880 }
0x2c2d   :  { %v1846_v36 = vmul.f32 %v2881_v62, %v1784_v37 }
0x2c8d   :  { %v1849_v29 = vpop.permute.xlu0 %1848 }
0x2c8e   :  { %v1851_v58 = vmul.f32 %v2881_v62, %v1849_v29 }
0x2c90   :  { %1853 = vrot.lane.b32.xlu1 %v1851_v58, %s2929_s13 }
0x2d02   :  { %v1854_v2 = vpop.permute.xlu1 %1853 }
0x2d03   :  { %v1856_v4 = vadd.f32 %v1854_v2, %v1846_v36 }
0x2d05   :  { %2882 = vtanh.f32 %v1856_v4 }
0x2d12   :  { %v2883_v11 = vpop.eup %2882 }
0x2d13   :  { %1859 = vrot.lane.b32.xlu0 %v2883_v11, %s2929_s13 }
0x2d85   :  { %v1860_v13 = vpop.permute.xlu0 %1859 }
0x2d86   :  { %v1862_v14 = vmul.f32 %v2881_v62, %v1860_v13 }
0x2d88   :  { %v1863_v60 = vpack.c.bf16 %v1862_v14, %v1862_v14 }
0x2d8a   :  { %1865 = vrot.lane.b32.xlu1 %v1863_v60, %s2930_s3 }
0x2dfc   :  { %v1866_v15 = vpop.permute.xlu1 %1865 }
0x2dfd   :  { %2667 = vmatmul.mubr.msk.bf16.vlgmr.msra.gmra.mxu1 %vm176_vm3, %v1866_v15 }
0x2dfe   :  { %2679 = vmatpush3.bf16.msra.mxu1 %v3385_v30  ;;  %2682 = vmatprep.mubr.msk.bf16.mxu1 %vm2927_vm2, %v2926_v1 }
0x2dff   :  { %2680 = vmatprep.subr.bf16.mxu1 %v2926_v1 }
0x2e02   :  { %2681 = vmatpush3.bf16.msra.mxu1 %v3393_v31 }
0x2e03   :  { %2694 = vmatprep.subr.bf16.mxu1 %v2926_v1 }
0x2ebd   :  { %v1904_v3 = vpop.f32.mrf.mxu1 }
0x2ebe   :  { %v1910_v18 = vadd.f32 %v1904_v3, %v1619_v17 }
0x2ebf   :  { %v2668_v32 = vpop.f32.mrf.mxu1 }
0x2ec0   :  { %2884 = vtanh.f32 %v1910_v18  ;;  %v2371_v6 = vmul.f32 -1.442695, %v1910_v18  ;;  %v1632_v32 = vadd.f32 %v3465_v46, %v3418_v41 }
0x2ec1   :  { %v1907_v47 = vpop.f32.mrf.mxu1 }
0x2ec2   :  { %2886 = vpow2.f32 %v2371_v6 }
0x2ec3   :  { %v2669_v9 = vpop.f32.mrf.mxu1 }
0x2ecd   :  { %v2885_v59 = vpop.eup %2884 }
0x2ece   :  { %1920 = vrot.lane.b32.xlu0 %v2885_v59, %s2929_s13 }
0x2ecf   :  { %v2887_v35 = vpop.eup %2886 }
0x2ed0   :  { %v1914_v21 = vadd.f32 1.0, %v2887_v35 }
0x2ed2   :  { %2888 = vrcp.f32 %v1914_v21 }
0x2edf   :  { %v2889_v16 = vpop.eup %2888 }
0x2ee0   :  { %v1918_v19 = vmul.f32 %v2889_v16, %v1856_v4 }
0x2f40   :  { %v1921_v27 = vpop.permute.xlu0 %1920 }
0x2f41   :  { %v1923_v22 = vmul.f32 %v2889_v16, %v1921_v27 }
0x2f43   :  { %1925 = vrot.lane.b32.xlu1 %v1923_v22, %s2929_s13 }
0x2fb5   :  { %v1926_v26 = vpop.permute.xlu1 %1925 }
0x2fb6   :  { %v1928_v12 = vadd.f32 %v1926_v26, %v1918_v19 }
0x2fb8   :  { %2890 = vtanh.f32 %v1928_v12 }
0x2fc5   :  { %v2891_v28 = vpop.eup %2890 }
0x2fc6   :  { %1931 = vrot.lane.b32.xlu0 %v2891_v28, %s2929_s13 }
0x3038   :  { %v1932_v23 = vpop.permute.xlu0 %1931 }
0x3039   :  { %v1934_v33 = vmul.f32 %v2889_v16, %v1932_v23 }
0x303b   :  { %v1935_v34 = vpack.c.bf16 %v1934_v33, %v1934_v33 }
0x303d   :  { %1937 = vrot.lane.b32.xlu1 %v1935_v34, %s2930_s3 }
0x30af   :  { %v1938_v37 = vpop.permute.xlu1 %1937 }
0x30b0   :  { %2675 = vmatmul.mubr.msk.bf16.vlgmr.msra.gmra.mxu0 %vm176_vm3, %v1938_v37 }
0x30b1   :  { %2687 = vmatpush3.bf16.msra.mxu0 %v3385_v30  ;;  %2690 = vmatprep.mubr.msk.bf16.mxu0 %vm2927_vm2, %v2926_v1 }
0x30b2   :  { %2688 = vmatprep.subr.bf16.mxu0 %v2926_v1 }
0x30b5   :  { %2689 = vmatpush3.bf16.msra.mxu0 %v3393_v31 }
0x30b6   :  { %2702 = vmatprep.subr.bf16.mxu0 %v2926_v1 }
0x3170   :  { %v1976_v39 = vpop.f32.mrf.mxu0 }
0x3171   :  { %v1982_v7 = vadd.f32 %v1976_v39, %v1624_v38 }
0x3172   :  { %v2676_v40 = vpop.f32.mrf.mxu0 }
0x3173   :  { %2892 = vtanh.f32 %v1982_v7  ;;  %v2373_v63 = vmul.f32 -1.442695, %v1982_v7  ;;  %v1635_v7 = vadd.f32 %v3469_v25, %v3418_v41 }
0x3174   :  { %v1979_v10 = vpop.f32.mrf.mxu0 }
0x3175   :  { %2894 = vpow2.f32 %v2373_v63 }
0x3176   :  { %v2677_v43 = vpop.f32.mrf.mxu0 }
0x3180   :  { %v2893_v44 = vpop.eup %2892 }
0x3181   :  { %1992 = vrot.lane.b32.xlu0 %v2893_v44, %s2929_s13 }
0x3182   :  { %v2895_v57 = vpop.eup %2894 }
0x3183   :  { %v1986_v8 = vadd.f32 1.0, %v2895_v57 }
0x3185   :  { %2896 = vrcp.f32 %v1986_v8 }
0x3192   :  { %v2897_v53 = vpop.eup %2896 }
0x3193   :  { %v1990_v0 = vmul.f32 %v2897_v53, %v1928_v12 }
0x31f3   :  { %v1993_v24 = vpop.permute.xlu0 %1992 }
0x31f4   :  { %v1995_v45 = vmul.f32 %v2897_v53, %v1993_v24 }
0x31f6   :  { %1997 = vrot.lane.b32.xlu1 %v1995_v45, %s2929_s13 }
0x3268   :  { %v1998_v48 = vpop.permute.xlu1 %1997 }
0x3269   :  { %v2000_v20 = vadd.f32 %v1998_v48, %v1990_v0 }
0x326b   :  { %2898 = vtanh.f32 %v2000_v20 }
0x3278   :  { %v2899_v50 = vpop.eup %2898 }
0x3279   :  { %2003 = vrot.lane.b32.xlu0 %v2899_v50, %s2929_s13  ;;  %v2730_v50 = vld [vmem:[%s3557_s10 + $0x8] sm:$0xff]  }
0x32eb   :  { %v2004_v52 = vpop.permute.xlu0 %2003 }
0x32ec   :  { %v2006_v55 = vmul.f32 %v2897_v53, %v2004_v52  ;;  %v2731_v52 = vld [vmem:[%s3557_s10] sm:$0xff]  }
0x32ee   :  { %v2007_v5 = vpack.c.bf16 %v2006_v55, %v2006_v55 }
0x32f0   :  { %2009 = vrot.lane.b32.xlu1 %v2007_v5, %s2930_s3 }
0x3362   :  { %v2010_v56 = vpop.permute.xlu1 %2009 }
0x3363   :  { %2683 = vmatmul.mubr.msk.bf16.vlgmr.msra.gmra.mxu1 %vm176_vm3, %v2010_v56 }
0x3364   :  { %2695 = vmatpush3.bf16.msra.mxu1 %v3385_v30  ;;  %2698 = vmatprep.mubr.msk.bf16.mxu1 %vm2927_vm2, %v2926_v1 }
0x3365   :  { %2696 = vmatprep.subr.bf16.mxu1 %v2926_v1 }
0x3368   :  { %2697 = vmatpush3.bf16.msra.mxu1 %v3393_v31 }
0x3423   :  { %v2048_v51 = vpop.f32.mrf.mxu1 }
0x3424   :  { %v2054_v54 = vadd.f32 %v2048_v51, %v1627_v61 }
0x3425   :  { %v2684_v42 = vpop.f32.mrf.mxu1 }
0x3426   :  { %2900 = vtanh.f32 %v2054_v54  ;;  %v2375_v30 = vmul.f32 -1.442695, %v2054_v54  ;;  %v2380_v54 = vld [vmem:[%s3558_s11] ss:$0 sm:$0xff] }
0x3427   :  { %v2051_v62 = vpop.f32.mrf.mxu1 }
0x3428   :  { %2902 = vpow2.f32 %v2375_v30 }
0x3429   :  { %v2685_v29 = vpop.f32.mrf.mxu1 }
0x3433   :  { %v2901_v58 = vpop.eup %2900 }
0x3434   :  { %2064 = vrot.lane.b32.xlu0 %v2901_v58, %s2929_s13 }
0x3435   :  { %v2903_v36 = vpop.eup %2902 }
0x3436   :  { %v2058_v2 = vadd.f32 1.0, %v2903_v36 }
0x3438   :  { %2904 = vrcp.f32 %v2058_v2 }
0x3445   :  { %v2905_v4 = vpop.eup %2904 }
0x3446   :  { %v2062_v49 = vmul.f32 %v2905_v4, %v2000_v20 }
0x34a6   :  { %v2065_v11 = vpop.permute.xlu0 %2064 }
0x34a7   :  { %v2067_v31 = vmul.f32 %v2905_v4, %v2065_v11 }
0x34a9   :  { %2069 = vrot.lane.b32.xlu1 %v2067_v31, %s2929_s13 }
0x351b   :  { %v2070_v13 = vpop.permute.xlu1 %2069 }
0x351c   :  { %v2072_v14 = vadd.f32 %v2070_v13, %v2062_v49 }
0x351e   :  { %2906 = vtanh.f32 %v2072_v14 }
0x352b   :  { %v2907_v60 = vpop.eup %2906 }
0x352c   :  { %2075 = vrot.lane.b32.xlu0 %v2907_v60, %s2929_s13 }
0x359e   :  { %v2076_v15 = vpop.permute.xlu0 %2075 }
0x359f   :  { %v2078_v17 = vmul.f32 %v2905_v4, %v2076_v15 }
0x35a1   :  { %v2079_v3 = vpack.c.bf16 %v2078_v17, %v2078_v17 }
0x35a3   :  { %2081 = vrot.lane.b32.xlu1 %v2079_v3, %s2930_s3 }
0x3615   :  { %v2082_v18 = vpop.permute.xlu1 %2081 }
0x3616   :  { %2691 = vmatmul.mubr.msk.bf16.vlgmr.msra.gmra.mxu0 %vm176_vm3, %v2082_v18 }
0x3617   :  { %2706 = vmatprep.mubr.msk.bf16.mxu0 %vm2927_vm2, %v2926_v1  ;;  %2703 = vmatpush3.bf16.msra.mxu0 %v2730_v50 }
0x3618   :  { %2704 = vmatprep.subr.bf16.mxu0 %v2926_v1 }
0x361b   :  { %2705 = vmatpush3.bf16.msra.mxu0 %v2731_v52 }
0x36d6   :  { %v2120_v47 = vpop.f32.mrf.mxu0 }
0x36d7   :  { %v2126_v9 = vadd.f32 %v2120_v47, %v1632_v32 }
0x36d8   :  { %v2692_v59 = vpop.f32.mrf.mxu0 }
0x36d9   :  { %2908 = vtanh.f32 %v2126_v9  ;;  %v2377_v16 = vmul.f32 -1.442695, %v2126_v9 }
0x36da   :  { %v2123_v6 = vpop.f32.mrf.mxu0 }
0x36db   :  { %2910 = vpow2.f32 %v2377_v16 }
0x36dc   :  { %v2693_v35 = vpop.f32.mrf.mxu0 }
0x36e6   :  { %v2909_v21 = vpop.eup %2908 }
0x36e7   :  { %2136 = vrot.lane.b32.xlu0 %v2909_v21, %s2929_s13 }
0x36e8   :  { %v2911_v27 = vpop.eup %2910 }
0x36e9   :  { %v2130_v22 = vadd.f32 1.0, %v2911_v27 }
0x36eb   :  { %2912 = vrcp.f32 %v2130_v22 }
0x36f8   :  { %v2913_v19 = vpop.eup %2912 }
0x36f9   :  { %v2134_v46 = vmul.f32 %v2913_v19, %v2072_v14 }
0x3759   :  { %v2137_v26 = vpop.permute.xlu0 %2136 }
0x375a   :  { %v2139_v12 = vmul.f32 %v2913_v19, %v2137_v26 }
0x375c   :  { %2141 = vrot.lane.b32.xlu1 %v2139_v12, %s2929_s13 }
0x37ce   :  { %v2142_v28 = vpop.permute.xlu1 %2141 }
0x37cf   :  { %v2144_v23 = vadd.f32 %v2142_v28, %v2134_v46 }
0x37d1   :  { %2914 = vtanh.f32 %v2144_v23 }
0x37de   :  { %v2915_v33 = vpop.eup %2914 }
0x37df   :  { %2147 = vrot.lane.b32.xlu0 %v2915_v33, %s2929_s13 }
0x3851   :  { %v2148_v34 = vpop.permute.xlu0 %2147 }
0x3852   :  { %v2150_v37 = vmul.f32 %v2913_v19, %v2148_v34 }
0x3854   :  { %v2151_v38 = vpack.c.bf16 %v2150_v37, %v2150_v37 }
0x3856   :  { %2153 = vrot.lane.b32.xlu1 %v2151_v38, %s2930_s3 }
0x38c8   :  { %v2154_v39 = vpop.permute.xlu1 %2153 }
0x38c9   :  { %2699 = vmatmul.mubr.msk.bf16.vlgmr.msra.gmra.mxu1 %vm176_vm3, %v2154_v39 }
0x3989   :  { %v2192_v40 = vpop.f32.mrf.mxu1 }
0x398a   :  { %v2198_v10 = vadd.f32 %v2192_v40, %v1635_v7 }
0x398b   :  { %v2700_v43 = vpop.f32.mrf.mxu1 }
0x398c   :  { %2916 = vtanh.f32 %v2198_v10  ;;  %v2379_v8 = vmul.f32 -1.442695, %v2198_v10 }
0x398d   :  { %v2195_v44 = vpop.f32.mrf.mxu1 }
0x398e   :  { %2918 = vpow2.f32 %v2379_v8 }
0x398f   :  { %v2701_v63 = vpop.f32.mrf.mxu1 }
0x3999   :  { %v2917_v57 = vpop.eup %2916 }
0x399a   :  { %2208 = vrot.lane.b32.xlu0 %v2917_v57, %s2929_s13 }
0x399b   :  { %v2919_v53 = vpop.eup %2918 }
0x399c   :  { %v2202_v24 = vadd.f32 1.0, %v2919_v53 }
0x399e   :  { %2920 = vrcp.f32 %v2202_v24 }
0x39ab   :  { %v2921_v45 = vpop.eup %2920 }
0x39ac   :  { %v2206_v41 = vmul.f32 %v2921_v45, %v2144_v23 }
0x3a0c   :  { %v2209_v0 = vpop.permute.xlu0 %2208 }
0x3a0d   :  { %v2211_v48 = vmul.f32 %v2921_v45, %v2209_v0 }
0x3a0f   :  { %2213 = vrot.lane.b32.xlu1 %v2211_v48, %s2929_s13 }
0x3a81   :  { %v2214_v25 = vpop.permute.xlu1 %2213 }
0x3a82   :  { %v2216_v20 = vadd.f32 %v2214_v25, %v2206_v41 }
0x3a84   :  { %2922 = vtanh.f32 %v2216_v20 }
0x3a91   :  { %v2923_v55 = vpop.eup %2922 }
0x3a92   :  { %2219 = vrot.lane.b32.xlu0 %v2923_v55, %s2929_s13 }
0x3b04   :  { %v2220_v5 = vpop.permute.xlu0 %2219 }
0x3b05   :  { %v2222_v56 = vmul.f32 %v2921_v45, %v2220_v5 }
0x3b07   :  { %v2223_v61 = vpack.c.bf16 %v2222_v56, %v2222_v56 }
0x3b09   :  { %2236 = vrot.lane.b32.xlu1 %v2223_v61, %s2930_s3 }
0x3b7b   :  { %v2237_v51 = vpop.permute.xlu1 %2236 }
0x3b7c   :  { %2707 = vmatmul.mubr.msk.bf16.vlgmr.msra.gmra.mxu0 %vm176_vm3, %v2237_v51 }
0x3c3c   :  { %v2287_v42 = vpop.f32.mrf.mxu0 }
0x3c3d   :  { %v2288_v62 = vadd.f32 %v2380_v54, %v2287_v42 }
0x3c3e   :  { %v2708_v29 = vpop.f32.mrf.mxu0 }
0x3c3f   :  { %v2293_v1 = vmul.f32 %v2288_v62, %v2288_v62 }
0x3c40   :  { %v2290_v58 = vpop.f32.mrf.mxu0 }
0x3c41   :  { %v2295_v30 = vsel %vm2294_vm4, %v2293_v1, 0.0 }
0x3c42   :  { %2296 = vadd.xlane.f32.xlu0 %v2295_v30  ;;  %v2709_v36 = vpop.f32.mrf.mxu0 }
0x3ccb   :  { %v2297_v2 = vpop.xlane.xlu0 %2296 }
0x3ccc   :  { %v2298_v4 = vadd.f32 1e-12, %v2297_v2 }
0x3cce   :  { %2924 = vrsqrt.f32 %v2298_v4 }
0x3cdb   :  { %v2925_v11 = vpop.eup %2924 }
0x3cdc   :  { %v2300_v31 = vmul.f32 %v2925_v11, %v2288_v62 }
0x3cde   :  { %2301 = vst.msk [vmem:[%s3559_s12] sm:$0xff] %vm2294_vm4, %v2300_v31 }

</bundles_post_ra>
